<compile_context>
chip_gen: v7x
topology: tpu7x:2x2x1
jax: 0.10.0
libtpu: 0.0.40
codegen_flags: <defaults>
</compile_context>

<pallas_src>
import functools

import jax
import jax.numpy as jnp
from jax import lax
from jax.experimental import pallas as pl
from jax.experimental.pallas import tpu as pltpu


def rnn_seq_kernel(ip_ref, h0_ref, w_ip_ref, w_hh_ref, w_h_ref, b_in_ref,
                   w_tail_ref, b_tail_ref, out_ref, h_out_ref,
                   zscr, hscr, *, T, B, h_s):
    # Hoist all weight loads / bias broadcasts out of the serial loop
    # (JAX does not CSE broadcast_in_dim inside loops).
    w_ip = w_ip_ref[...]        # (ip_s, h_s + o_s)
    w_hh = w_hh_ref[...]        # (h_s, h_s)        hidden-column recurrence
    w_h = w_h_ref[...]          # (h_s, h_s + o_s)  full hidden->z weight
    b_in = b_in_ref[...]        # (1, h_s + o_s)
    w_tail = w_tail_ref[...]    # (h_s + o_s, o_s)  folded l3..l6
    b_tail = b_tail_ref[...]    # (1, o_s)

    # Batched input projection for all T steps at once (M = T*B rows):
    #   zscr[t*B + b, :] = ip[t, b, :] @ W_in_ip + b_in
    zscr[...] = (jnp.dot(ip_ref[...], w_ip,
                         preferred_element_type=jnp.float32) + b_in)

    # Serial recurrence over the hidden columns only:
    #   h_new = ip_proj_h[t] + h_prev @ W_hh      (bias already in ip_proj)
    # The entering hidden state of each step is stacked into hscr for the
    # batched epilogue below.
    def step(t, h):
        hscr[pl.ds(t * B, B), :] = h
        blk = zscr[pl.ds(t * B, B), :]          # (B, h_s + o_s)
        return blk[:, :h_s] + jnp.dot(h, w_hh,
                                      preferred_element_type=jnp.float32)

    h_final = lax.fori_loop(0, T, step, h0_ref[...], unroll=True)

    # Batched epilogue over all T*B rows (off the serial path):
    #   z      = ip_proj + h_prev @ W_in_h  == cat(h_new, (l1+l2)/2)(ip_c)
    #   logits = z @ W_tail + b_tail        == l6(l5(l4(l3(z))))  (eval mode)
    z = zscr[...] + jnp.dot(hscr[...], w_h, preferred_element_type=jnp.float32)
    logits = jnp.dot(z, w_tail, preferred_element_type=jnp.float32) + b_tail

    # LogSoftmax(dim=1), max-shifted for stability.
    m = jnp.max(logits, axis=1, keepdims=True)
    shifted = logits - m
    lse = jnp.log(jnp.sum(jnp.exp(shifted), axis=1, keepdims=True))

    # Single flush of the whole sequence output and final hidden state.
    out_ref[...] = shifted - lse
    h_out_ref[...] = h_final


def init_linear(key, in_f, out_f):
    """Deterministic PyTorch-style init: U(-1/sqrt(in), 1/sqrt(in)).

    Weights are stored pre-transposed as (in_f, out_f); bias as (1, out_f).
    """
    kw, kb = jax.random.split(key)
    bound = 1.0 / jnp.sqrt(jnp.float32(in_f))
    w = jax.random.uniform(kw, (in_f, out_f), jnp.float32, -bound, bound)
    b = jax.random.uniform(kb, (1, out_f), jnp.float32, -bound, bound)
    return w, b


def _fold_params(params):
    """Eval-mode weight folding (dropouts are identity)."""
    w_h1, b_h1 = params["h1"]
    w_l1, b_l1 = params["l1"]
    w_l2, b_l2 = params["l2"]
    w_l3, b_l3 = params["l3"]
    w_l4, b_l4 = params["l4"]
    w_l5, b_l5 = params["l5"]
    w_l6, b_l6 = params["l6"]

    h_s = w_h1.shape[1]
    ip_s = w_h1.shape[0] - h_s

    # Only (l1(x) + l2(x)) / 2 is consumed downstream.
    w_l12 = 0.5 * (w_l1 + w_l2)
    b_l12 = 0.5 * (b_l1 + b_l2)

    # Fuse h1 / l12 output columns -> one matmul over ip_c; split rows so the
    # kernel never concatenates (ip, h).
    w_in = jnp.concatenate([w_h1, w_l12], axis=1)        # (ip_s+h_s, h_s+o_s)
    b_in = jnp.concatenate([b_h1, b_l12], axis=1)        # (1, h_s+o_s)
    w_in_ip = w_in[:ip_s]                                # (ip_s, h_s+o_s)
    w_in_h = w_in[ip_s:]                                 # (h_s,  h_s+o_s)

    # Compose the purely linear tail l3 -> l4 -> l5 -> l6.
    w_tail = w_l3 @ w_l4 @ w_l5 @ w_l6                   # (h_s+o_s, o_s)
    b_tail = ((b_l3 @ w_l4 + b_l4) @ w_l5 + b_l5) @ w_l6 + b_l6   # (1, o_s)

    return w_in_ip, w_in_h, b_in, w_tail, b_tail


@jax.jit
def rnn_forward_seq(ip_seq, h0, params):
    """Run the RNN over a whole sequence in ONE kernel invocation.

    ip_seq: (T, B, ip_s), h0: (B, h_s)
    returns (out_seq: (T, B, o_s) log-probs, h_final: (B, h_s))
    """
    T, B, ip_s = ip_seq.shape
    h_s = h0.shape[1]
    o_s = params["l6"][0].shape[1]
    hs_os = h_s + o_s

    w_in_ip, w_in_h, b_in, w_tail, b_tail = _fold_params(params)
    w_hh = w_in_h[:, :h_s]                   # recurrence-only columns

    ip_flat = ip_seq.reshape(T * B, ip_s)    # free (contiguous) reshape

    kernel = functools.partial(rnn_seq_kernel, T=T, B=B, h_s=h_s)

    out_flat, h_final = pl.pallas_call(
        kernel,
        grid=(1,),                                         # loop is internal
        in_specs=[
            pl.BlockSpec((T * B, ip_s), lambda i: (0, 0)),  # whole sequence
            pl.BlockSpec((B, h_s), lambda i: (0, 0)),       # h0
            pl.BlockSpec((ip_s, hs_os), lambda i: (0, 0)),  # W_in (ip rows)
            pl.BlockSpec((h_s, h_s), lambda i: (0, 0)),     # W_hh (recurrence)
            pl.BlockSpec((h_s, hs_os), lambda i: (0, 0)),   # W_in (h rows)
            pl.BlockSpec((1, hs_os), lambda i: (0, 0)),     # b_in
            pl.BlockSpec((hs_os, o_s), lambda i: (0, 0)),   # folded tail W
            pl.BlockSpec((1, o_s), lambda i: (0, 0)),       # folded tail b
        ],
        out_specs=(
            pl.BlockSpec((T * B, o_s), lambda i: (0, 0)),   # all log-probs
            pl.BlockSpec((B, h_s), lambda i: (0, 0)),       # final hidden
        ),
        out_shape=(
            jax.ShapeDtypeStruct((T * B, o_s), jnp.float32),
            jax.ShapeDtypeStruct((B, h_s), jnp.float32),
        ),
        scratch_shapes=[
            pltpu.VMEM((T * B, hs_os), jnp.float32),        # ip_proj (z)
            pltpu.VMEM((T * B, h_s), jnp.float32),          # stacked h_prev
        ],
        compiler_params=pltpu.CompilerParams(
            dimension_semantics=("arbitrary",)),
    )(ip_flat, h0, w_in_ip, w_hh, w_in_h, b_in, w_tail, b_tail)

    return out_flat.reshape(T, B, o_s), h_final


def reference_step(ip, h, params):
    """Pure-JAX reference mirroring the PyTorch module (eval mode)."""
    def lin(x, p):
        w, b = p
        return x @ w + b

    ip_c = jnp.concatenate([ip, h], axis=1)
    h_new = lin(ip_c, params["h1"])
    output = lin(ip_c, params["l1"])
    o1 = lin(ip_c, params["l2"])
    out_c = jnp.concatenate([h_new, output], axis=1)
    out_c1 = jnp.concatenate([h_new, o1], axis=1)
    oc1 = (out_c + out_c1) / 2.0
    output = lin(oc1, params["l3"])
    output = lin(output, params["l4"])
    output = lin(output, params["l5"])
    output = lin(output, params["l6"])
    return jax.nn.log_softmax(output, axis=1), h_new


def reference_seq(ip_seq, h0, params):
    outs = []
    h = h0
    for t in range(ip_seq.shape[0]):
        o, h = reference_step(ip_seq[t], h, params)
        outs.append(o)
    return jnp.stack(outs, axis=0), h


if __name__ == "__main__":
    # B=8 fills the 8 sublanes; T=16 gives M=T*B=128 rows for the batched
    # (non-recurrent) phases — one full MXU pass on v5e, half a pass on v6e/v7x.
    T, B, ip_s, h_s, o_s = 16, 8, 16, 32, 24

    key = jax.random.PRNGKey(0)
    keys = jax.random.split(key, 8)

    params = {
        "h1": init_linear(keys[0], ip_s + h_s, h_s),
        "l1": init_linear(keys[1], ip_s + h_s, o_s),
        "l2": init_linear(keys[2], ip_s + h_s, o_s),
        "l3": init_linear(keys[3], h_s + o_s, o_s),
        "l4": init_linear(keys[4], o_s, o_s),
        "l5": init_linear(keys[5], o_s, o_s),
        "l6": init_linear(keys[6], o_s, o_s),
    }

    ip_seq = jax.random.normal(keys[7], (T, B, ip_s), jnp.float32)
    h0 = jnp.zeros((B, h_s), jnp.float32)   # initHidden, broadcast over batch

    out_seq, h_final = rnn_forward_seq(ip_seq, h0, params)
    jax.block_until_ready((out_seq, h_final))

    ref_out, ref_h = reference_seq(ip_seq, h0, params)
    assert out_seq.shape == (T, B, o_s) and h_final.shape == (B, h_s)
    assert jnp.allclose(out_seq, ref_out, atol=1e-4, rtol=1e-4)
    assert jnp.allclose(h_final, ref_h, atol=1e-4, rtol=1e-4)

    print("KERNEL_OK")
</pallas_src>

<mosaic_0001>
module attributes {stable_mosaic.version = 11 : i64} {
  func.func @rnn_seq_kernel(%arg0: i32, %arg1: memref<128x16xf32, #tpu.memory_space<vmem>>, %arg2: memref<8x32xf32, #tpu.memory_space<vmem>>, %arg3: memref<16x56xf32, #tpu.memory_space<vmem>>, %arg4: memref<32x32xf32, #tpu.memory_space<vmem>>, %arg5: memref<32x56xf32, #tpu.memory_space<vmem>>, %arg6: memref<1x56xf32, #tpu.memory_space<vmem>>, %arg7: memref<56x24xf32, #tpu.memory_space<vmem>>, %arg8: memref<1x24xf32, #tpu.memory_space<vmem>>, %arg9: memref<128x24xf32, #tpu.memory_space<vmem>>, %arg10: memref<8x32xf32, #tpu.memory_space<vmem>>, %arg11: memref<128x56xf32, #tpu.memory_space<vmem>>, %arg12: memref<128x32xf32, #tpu.memory_space<vmem>>) attributes {dimension_semantics = [#tpu.dimension_semantics<arbitrary>], iteration_bounds = array<i64: 1>, scalar_prefetch = 0 : i64, scratch_operands = 2 : i64, tpu.core_type = #tpu.core_type<tc>, window_params = [{pipeline_mode = #tpu.pipeline_mode<synchronous>, transform_indices = @transform_0, window_bounds = array<i64: 128, 16>}, {pipeline_mode = #tpu.pipeline_mode<synchronous>, transform_indices = @transform_1, window_bounds = array<i64: 8, 32>}, {pipeline_mode = #tpu.pipeline_mode<synchronous>, transform_indices = @transform_2, window_bounds = array<i64: 16, 56>}, {pipeline_mode = #tpu.pipeline_mode<synchronous>, transform_indices = @transform_3, window_bounds = array<i64: 32, 32>}, {pipeline_mode = #tpu.pipeline_mode<synchronous>, transform_indices = @transform_4, window_bounds = array<i64: 32, 56>}, {pipeline_mode = #tpu.pipeline_mode<synchronous>, transform_indices = @transform_5, window_bounds = array<i64: 1, 56>}, {pipeline_mode = #tpu.pipeline_mode<synchronous>, transform_indices = @transform_6, window_bounds = array<i64: 56, 24>}, {pipeline_mode = #tpu.pipeline_mode<synchronous>, transform_indices = @transform_7, window_bounds = array<i64: 1, 24>}, {pipeline_mode = #tpu.pipeline_mode<synchronous>, transform_indices = @transform_8, window_bounds = array<i64: 128, 24>}, {pipeline_mode = #tpu.pipeline_mode<synchronous>, transform_indices = @transform_9, window_bounds = array<i64: 8, 32>}]} {
    %c0 = arith.constant 0 : index
    %c0_0 = arith.constant 0 : index
    %0 = vector.load %arg3[%c0, %c0_0] : memref<16x56xf32, #tpu.memory_space<vmem>>, vector<16x56xf32>
    %c0_1 = arith.constant 0 : index
    %c0_2 = arith.constant 0 : index
    %1 = vector.load %arg4[%c0_1, %c0_2] : memref<32x32xf32, #tpu.memory_space<vmem>>, vector<32x32xf32>
    %c0_3 = arith.constant 0 : index
    %c0_4 = arith.constant 0 : index
    %2 = vector.load %arg5[%c0_3, %c0_4] : memref<32x56xf32, #tpu.memory_space<vmem>>, vector<32x56xf32>
    %c0_5 = arith.constant 0 : index
    %c0_6 = arith.constant 0 : index
    %3 = vector.load %arg6[%c0_5, %c0_6] : memref<1x56xf32, #tpu.memory_space<vmem>>, vector<1x56xf32>
    %c0_7 = arith.constant 0 : index
    %c0_8 = arith.constant 0 : index
    %4 = vector.load %arg7[%c0_7, %c0_8] : memref<56x24xf32, #tpu.memory_space<vmem>>, vector<56x24xf32>
    %c0_9 = arith.constant 0 : index
    %c0_10 = arith.constant 0 : index
    %5 = vector.load %arg8[%c0_9, %c0_10] : memref<1x24xf32, #tpu.memory_space<vmem>>, vector<1x24xf32>
    %c0_11 = arith.constant 0 : index
    %c0_12 = arith.constant 0 : index
    %6 = vector.load %arg1[%c0_11, %c0_12] : memref<128x16xf32, #tpu.memory_space<vmem>>, vector<128x16xf32>
    %cst = arith.constant dense<0.000000e+00> : vector<128x56xf32>
    %7 = tpu.matmul %6, %0, %cst {dimension_numbers = #tpu.dot_dimension_numbers<[1], [0], [0], [1], [0, 0, 1, 1], [], []>} : vector<128x16xf32>, vector<16x56xf32>, vector<128x56xf32> -> vector<128x56xf32>
    %8 = vector.broadcast %3 : vector<1x56xf32> to vector<128x56xf32>
    %9 = arith.addf %7, %8 : vector<128x56xf32>
    %c0_13 = arith.constant 0 : index
    %c0_14 = arith.constant 0 : index
    %10 = vector.load %arg11[%c0_13, %c0_14] : memref<128x56xf32, #tpu.memory_space<vmem>>, vector<128x56xf32>
    tpu.vector_store %arg11[%c0_13, %c0_14], %9 {strides = array<i32>} : memref<128x56xf32, #tpu.memory_space<vmem>>, vector<128x56xf32>,
    %c0_15 = arith.constant 0 : index
    %c0_16 = arith.constant 0 : index
    %11 = vector.load %arg2[%c0_15, %c0_16] : memref<8x32xf32, #tpu.memory_space<vmem>>, vector<8x32xf32>
    %c0_i32 = arith.constant 0 : i32
    %c8_i32 = arith.constant 8 : i32
    %12 = arith.muli %c0_i32, %c8_i32 : i32
    %13 = arith.index_cast %12 : i32 to index
    %c0_17 = arith.constant 0 : index
    %14 = vector.load %arg12[%13, %c0_17] : memref<128x32xf32, #tpu.memory_space<vmem>>, vector<8x32xf32>
    tpu.vector_store %arg12[%13, %c0_17], %11 {strides = array<i32>} : memref<128x32xf32, #tpu.memory_space<vmem>>, vector<8x32xf32>,
    %c8_i32_18 = arith.constant 8 : i32
    %15 = arith.muli %c0_i32, %c8_i32_18 : i32
    %16 = arith.index_cast %15 : i32 to index
    %c0_19 = arith.constant 0 : index
    %17 = vector.load %arg11[%16, %c0_19] : memref<128x56xf32, #tpu.memory_space<vmem>>, vector<8x56xf32>
    %18 = vector.extract_strided_slice %17 {offsets = [0, 0], sizes = [8, 32], strides = [1, 1]} : vector<8x56xf32> to vector<8x32xf32>
    %cst_20 = arith.constant dense<0.000000e+00> : vector<8x32xf32>
    %19 = tpu.matmul %11, %1, %cst_20 {dimension_numbers = #tpu.dot_dimension_numbers<[1], [0], [0], [1], [0, 0, 1, 1], [], []>} : vector<8x32xf32>, vector<32x32xf32>, vector<8x32xf32> -> vector<8x32xf32>
    %20 = arith.addf %18, %19 : vector<8x32xf32>
    %c1_i32 = arith.constant 1 : i32
    %c8_i32_21 = arith.constant 8 : i32
    %21 = arith.muli %c1_i32, %c8_i32_21 : i32
    %22 = arith.index_cast %21 : i32 to index
    %c0_22 = arith.constant 0 : index
    %23 = vector.load %arg12[%22, %c0_22] : memref<128x32xf32, #tpu.memory_space<vmem>>, vector<8x32xf32>
    tpu.vector_store %arg12[%22, %c0_22], %20 {strides = array<i32>} : memref<128x32xf32, #tpu.memory_space<vmem>>, vector<8x32xf32>,
    %c8_i32_23 = arith.constant 8 : i32
    %24 = arith.muli %c1_i32, %c8_i32_23 : i32
    %25 = arith.index_cast %24 : i32 to index
    %c0_24 = arith.constant 0 : index
    %26 = vector.load %arg11[%25, %c0_24] : memref<128x56xf32, #tpu.memory_space<vmem>>, vector<8x56xf32>
    %27 = vector.extract_strided_slice %26 {offsets = [0, 0], sizes = [8, 32], strides = [1, 1]} : vector<8x56xf32> to vector<8x32xf32>
    %cst_25 = arith.constant dense<0.000000e+00> : vector<8x32xf32>
    %28 = tpu.matmul %20, %1, %cst_25 {dimension_numbers = #tpu.dot_dimension_numbers<[1], [0], [0], [1], [0, 0, 1, 1], [], []>} : vector<8x32xf32>, vector<32x32xf32>, vector<8x32xf32> -> vector<8x32xf32>
    %29 = arith.addf %27, %28 : vector<8x32xf32>
    %c2_i32 = arith.constant 2 : i32
    %c8_i32_26 = arith.constant 8 : i32
    %30 = arith.muli %c2_i32, %c8_i32_26 : i32
    %31 = arith.index_cast %30 : i32 to index
    %c0_27 = arith.constant 0 : index
    %32 = vector.load %arg12[%31, %c0_27] : memref<128x32xf32, #tpu.memory_space<vmem>>, vector<8x32xf32>
    tpu.vector_store %arg12[%31, %c0_27], %29 {strides = array<i32>} : memref<128x32xf32, #tpu.memory_space<vmem>>, vector<8x32xf32>,
    %c8_i32_28 = arith.constant 8 : i32
    %33 = arith.muli %c2_i32, %c8_i32_28 : i32
    %34 = arith.index_cast %33 : i32 to index
    %c0_29 = arith.constant 0 : index
    %35 = vector.load %arg11[%34, %c0_29] : memref<128x56xf32, #tpu.memory_space<vmem>>, vector<8x56xf32>
    %36 = vector.extract_strided_slice %35 {offsets = [0, 0], sizes = [8, 32], strides = [1, 1]} : vector<8x56xf32> to vector<8x32xf32>
    %cst_30 = arith.constant dense<0.000000e+00> : vector<8x32xf32>
    %37 = tpu.matmul %29, %1, %cst_30 {dimension_numbers = #tpu.dot_dimension_numbers<[1], [0], [0], [1], [0, 0, 1, 1], [], []>} : vector<8x32xf32>, vector<32x32xf32>, vector<8x32xf32> -> vector<8x32xf32>
    %38 = arith.addf %36, %37 : vector<8x32xf32>
    %c3_i32 = arith.constant 3 : i32
    %c8_i32_31 = arith.constant 8 : i32
    %39 = arith.muli %c3_i32, %c8_i32_31 : i32
    %40 = arith.index_cast %39 : i32 to index
    %c0_32 = arith.constant 0 : index
    %41 = vector.load %arg12[%40, %c0_32] : memref<128x32xf32, #tpu.memory_space<vmem>>, vector<8x32xf32>
    tpu.vector_store %arg12[%40, %c0_32], %38 {strides = array<i32>} : memref<128x32xf32, #tpu.memory_space<vmem>>, vector<8x32xf32>,
    %c8_i32_33 = arith.constant 8 : i32
    %42 = arith.muli %c3_i32, %c8_i32_33 : i32
    %43 = arith.index_cast %42 : i32 to index
    %c0_34 = arith.constant 0 : index
    %44 = vector.load %arg11[%43, %c0_34] : memref<128x56xf32, #tpu.memory_space<vmem>>, vector<8x56xf32>
    %45 = vector.extract_strided_slice %44 {offsets = [0, 0], sizes = [8, 32], strides = [1, 1]} : vector<8x56xf32> to vector<8x32xf32>
    %cst_35 = arith.constant dense<0.000000e+00> : vector<8x32xf32>
    %46 = tpu.matmul %38, %1, %cst_35 {dimension_numbers = #tpu.dot_dimension_numbers<[1], [0], [0], [1], [0, 0, 1, 1], [], []>} : vector<8x32xf32>, vector<32x32xf32>, vector<8x32xf32> -> vector<8x32xf32>
    %47 = arith.addf %45, %46 : vector<8x32xf32>
    %c4_i32 = arith.constant 4 : i32
    %c8_i32_36 = arith.constant 8 : i32
    %48 = arith.muli %c4_i32, %c8_i32_36 : i32
    %49 = arith.index_cast %48 : i32 to index
    %c0_37 = arith.constant 0 : index
    %50 = vector.load %arg12[%49, %c0_37] : memref<128x32xf32, #tpu.memory_space<vmem>>, vector<8x32xf32>
    tpu.vector_store %arg12[%49, %c0_37], %47 {strides = array<i32>} : memref<128x32xf32, #tpu.memory_space<vmem>>, vector<8x32xf32>,
    %c8_i32_38 = arith.constant 8 : i32
    %51 = arith.muli %c4_i32, %c8_i32_38 : i32
    %52 = arith.index_cast %51 : i32 to index
    %c0_39 = arith.constant 0 : index
    %53 = vector.load %arg11[%52, %c0_39] : memref<128x56xf32, #tpu.memory_space<vmem>>, vector<8x56xf32>
    %54 = vector.extract_strided_slice %53 {offsets = [0, 0], sizes = [8, 32], strides = [1, 1]} : vector<8x56xf32> to vector<8x32xf32>
    %cst_40 = arith.constant dense<0.000000e+00> : vector<8x32xf32>
    %55 = tpu.matmul %47, %1, %cst_40 {dimension_numbers = #tpu.dot_dimension_numbers<[1], [0], [0], [1], [0, 0, 1, 1], [], []>} : vector<8x32xf32>, vector<32x32xf32>, vector<8x32xf32> -> vector<8x32xf32>
    %56 = arith.addf %54, %55 : vector<8x32xf32>
    %c5_i32 = arith.constant 5 : i32
    %c8_i32_41 = arith.constant 8 : i32
    %57 = arith.muli %c5_i32, %c8_i32_41 : i32
    %58 = arith.index_cast %57 : i32 to index
    %c0_42 = arith.constant 0 : index
    %59 = vector.load %arg12[%58, %c0_42] : memref<128x32xf32, #tpu.memory_space<vmem>>, vector<8x32xf32>
    tpu.vector_store %arg12[%58, %c0_42], %56 {strides = array<i32>} : memref<128x32xf32, #tpu.memory_space<vmem>>, vector<8x32xf32>,
    %c8_i32_43 = arith.constant 8 : i32
    %60 = arith.muli %c5_i32, %c8_i32_43 : i32
    %61 = arith.index_cast %60 : i32 to index
    %c0_44 = arith.constant 0 : index
    %62 = vector.load %arg11[%61, %c0_44] : memref<128x56xf32, #tpu.memory_space<vmem>>, vector<8x56xf32>
    %63 = vector.extract_strided_slice %62 {offsets = [0, 0], sizes = [8, 32], strides = [1, 1]} : vector<8x56xf32> to vector<8x32xf32>
    %cst_45 = arith.constant dense<0.000000e+00> : vector<8x32xf32>
    %64 = tpu.matmul %56, %1, %cst_45 {dimension_numbers = #tpu.dot_dimension_numbers<[1], [0], [0], [1], [0, 0, 1, 1], [], []>} : vector<8x32xf32>, vector<32x32xf32>, vector<8x32xf32> -> vector<8x32xf32>
    %65 = arith.addf %63, %64 : vector<8x32xf32>
    %c6_i32 = arith.constant 6 : i32
    %c8_i32_46 = arith.constant 8 : i32
    %66 = arith.muli %c6_i32, %c8_i32_46 : i32
    %67 = arith.index_cast %66 : i32 to index
    %c0_47 = arith.constant 0 : index
    %68 = vector.load %arg12[%67, %c0_47] : memref<128x32xf32, #tpu.memory_space<vmem>>, vector<8x32xf32>
    tpu.vector_store %arg12[%67, %c0_47], %65 {strides = array<i32>} : memref<128x32xf32, #tpu.memory_space<vmem>>, vector<8x32xf32>,
    %c8_i32_48 = arith.constant 8 : i32
    %69 = arith.muli %c6_i32, %c8_i32_48 : i32
    %70 = arith.index_cast %69 : i32 to index
    %c0_49 = arith.constant 0 : index
    %71 = vector.load %arg11[%70, %c0_49] : memref<128x56xf32, #tpu.memory_space<vmem>>, vector<8x56xf32>
    %72 = vector.extract_strided_slice %71 {offsets = [0, 0], sizes = [8, 32], strides = [1, 1]} : vector<8x56xf32> to vector<8x32xf32>
    %cst_50 = arith.constant dense<0.000000e+00> : vector<8x32xf32>
    %73 = tpu.matmul %65, %1, %cst_50 {dimension_numbers = #tpu.dot_dimension_numbers<[1], [0], [0], [1], [0, 0, 1, 1], [], []>} : vector<8x32xf32>, vector<32x32xf32>, vector<8x32xf32> -> vector<8x32xf32>
    %74 = arith.addf %72, %73 : vector<8x32xf32>
    %c7_i32 = arith.constant 7 : i32
    %c8_i32_51 = arith.constant 8 : i32
    %75 = arith.muli %c7_i32, %c8_i32_51 : i32
    %76 = arith.index_cast %75 : i32 to index
    %c0_52 = arith.constant 0 : index
    %77 = vector.load %arg12[%76, %c0_52] : memref<128x32xf32, #tpu.memory_space<vmem>>, vector<8x32xf32>
    tpu.vector_store %arg12[%76, %c0_52], %74 {strides = array<i32>} : memref<128x32xf32, #tpu.memory_space<vmem>>, vector<8x32xf32>,
    %c8_i32_53 = arith.constant 8 : i32
    %78 = arith.muli %c7_i32, %c8_i32_53 : i32
    %79 = arith.index_cast %78 : i32 to index
    %c0_54 = arith.constant 0 : index
    %80 = vector.load %arg11[%79, %c0_54] : memref<128x56xf32, #tpu.memory_space<vmem>>, vector<8x56xf32>
    %81 = vector.extract_strided_slice %80 {offsets = [0, 0], sizes = [8, 32], strides = [1, 1]} : vector<8x56xf32> to vector<8x32xf32>
    %cst_55 = arith.constant dense<0.000000e+00> : vector<8x32xf32>
    %82 = tpu.matmul %74, %1, %cst_55 {dimension_numbers = #tpu.dot_dimension_numbers<[1], [0], [0], [1], [0, 0, 1, 1], [], []>} : vector<8x32xf32>, vector<32x32xf32>, vector<8x32xf32> -> vector<8x32xf32>
    %83 = arith.addf %81, %82 : vector<8x32xf32>
    %c8_i32_56 = arith.constant 8 : i32
    %c8_i32_57 = arith.constant 8 : i32
    %84 = arith.muli %c8_i32_56, %c8_i32_57 : i32
    %85 = arith.index_cast %84 : i32 to index
    %c0_58 = arith.constant 0 : index
    %86 = vector.load %arg12[%85, %c0_58] : memref<128x32xf32, #tpu.memory_space<vmem>>, vector<8x32xf32>
    tpu.vector_store %arg12[%85, %c0_58], %83 {strides = array<i32>} : memref<128x32xf32, #tpu.memory_space<vmem>>, vector<8x32xf32>,
    %c8_i32_59 = arith.constant 8 : i32
    %87 = arith.muli %c8_i32_56, %c8_i32_59 : i32
    %88 = arith.index_cast %87 : i32 to index
    %c0_60 = arith.constant 0 : index
    %89 = vector.load %arg11[%88, %c0_60] : memref<128x56xf32, #tpu.memory_space<vmem>>, vector<8x56xf32>
    %90 = vector.extract_strided_slice %89 {offsets = [0, 0], sizes = [8, 32], strides = [1, 1]} : vector<8x56xf32> to vector<8x32xf32>
    %cst_61 = arith.constant dense<0.000000e+00> : vector<8x32xf32>
    %91 = tpu.matmul %83, %1, %cst_61 {dimension_numbers = #tpu.dot_dimension_numbers<[1], [0], [0], [1], [0, 0, 1, 1], [], []>} : vector<8x32xf32>, vector<32x32xf32>, vector<8x32xf32> -> vector<8x32xf32>
    %92 = arith.addf %90, %91 : vector<8x32xf32>
    %c9_i32 = arith.constant 9 : i32
    %c8_i32_62 = arith.constant 8 : i32
    %93 = arith.muli %c9_i32, %c8_i32_62 : i32
    %94 = arith.index_cast %93 : i32 to index
    %c0_63 = arith.constant 0 : index
    %95 = vector.load %arg12[%94, %c0_63] : memref<128x32xf32, #tpu.memory_space<vmem>>, vector<8x32xf32>
    tpu.vector_store %arg12[%94, %c0_63], %92 {strides = array<i32>} : memref<128x32xf32, #tpu.memory_space<vmem>>, vector<8x32xf32>,
    %c8_i32_64 = arith.constant 8 : i32
    %96 = arith.muli %c9_i32, %c8_i32_64 : i32
    %97 = arith.index_cast %96 : i32 to index
    %c0_65 = arith.constant 0 : index
    %98 = vector.load %arg11[%97, %c0_65] : memref<128x56xf32, #tpu.memory_space<vmem>>, vector<8x56xf32>
    %99 = vector.extract_strided_slice %98 {offsets = [0, 0], sizes = [8, 32], strides = [1, 1]} : vector<8x56xf32> to vector<8x32xf32>
    %cst_66 = arith.constant dense<0.000000e+00> : vector<8x32xf32>
    %100 = tpu.matmul %92, %1, %cst_66 {dimension_numbers = #tpu.dot_dimension_numbers<[1], [0], [0], [1], [0, 0, 1, 1], [], []>} : vector<8x32xf32>, vector<32x32xf32>, vector<8x32xf32> -> vector<8x32xf32>
    %101 = arith.addf %99, %100 : vector<8x32xf32>
    %c10_i32 = arith.constant 10 : i32
    %c8_i32_67 = arith.constant 8 : i32
    %102 = arith.muli %c10_i32, %c8_i32_67 : i32
    %103 = arith.index_cast %102 : i32 to index
    %c0_68 = arith.constant 0 : index
    %104 = vector.load %arg12[%103, %c0_68] : memref<128x32xf32, #tpu.memory_space<vmem>>, vector<8x32xf32>
    tpu.vector_store %arg12[%103, %c0_68], %101 {strides = array<i32>} : memref<128x32xf32, #tpu.memory_space<vmem>>, vector<8x32xf32>,
    %c8_i32_69 = arith.constant 8 : i32
    %105 = arith.muli %c10_i32, %c8_i32_69 : i32
    %106 = arith.index_cast %105 : i32 to index
    %c0_70 = arith.constant 0 : index
    %107 = vector.load %arg11[%106, %c0_70] : memref<128x56xf32, #tpu.memory_space<vmem>>, vector<8x56xf32>
    %108 = vector.extract_strided_slice %107 {offsets = [0, 0], sizes = [8, 32], strides = [1, 1]} : vector<8x56xf32> to vector<8x32xf32>
    %cst_71 = arith.constant dense<0.000000e+00> : vector<8x32xf32>
    %109 = tpu.matmul %101, %1, %cst_71 {dimension_numbers = #tpu.dot_dimension_numbers<[1], [0], [0], [1], [0, 0, 1, 1], [], []>} : vector<8x32xf32>, vector<32x32xf32>, vector<8x32xf32> -> vector<8x32xf32>
    %110 = arith.addf %108, %109 : vector<8x32xf32>
    %c11_i32 = arith.constant 11 : i32
    %c8_i32_72 = arith.constant 8 : i32
    %111 = arith.muli %c11_i32, %c8_i32_72 : i32
    %112 = arith.index_cast %111 : i32 to index
    %c0_73 = arith.constant 0 : index
    %113 = vector.load %arg12[%112, %c0_73] : memref<128x32xf32, #tpu.memory_space<vmem>>, vector<8x32xf32>
    tpu.vector_store %arg12[%112, %c0_73], %110 {strides = array<i32>} : memref<128x32xf32, #tpu.memory_space<vmem>>, vector<8x32xf32>,
    %c8_i32_74 = arith.constant 8 : i32
    %114 = arith.muli %c11_i32, %c8_i32_74 : i32
    %115 = arith.index_cast %114 : i32 to index
    %c0_75 = arith.constant 0 : index
    %116 = vector.load %arg11[%115, %c0_75] : memref<128x56xf32, #tpu.memory_space<vmem>>, vector<8x56xf32>
    %117 = vector.extract_strided_slice %116 {offsets = [0, 0], sizes = [8, 32], strides = [1, 1]} : vector<8x56xf32> to vector<8x32xf32>
    %cst_76 = arith.constant dense<0.000000e+00> : vector<8x32xf32>
    %118 = tpu.matmul %110, %1, %cst_76 {dimension_numbers = #tpu.dot_dimension_numbers<[1], [0], [0], [1], [0, 0, 1, 1], [], []>} : vector<8x32xf32>, vector<32x32xf32>, vector<8x32xf32> -> vector<8x32xf32>
    %119 = arith.addf %117, %118 : vector<8x32xf32>
    %c12_i32 = arith.constant 12 : i32
    %c8_i32_77 = arith.constant 8 : i32
    %120 = arith.muli %c12_i32, %c8_i32_77 : i32
    %121 = arith.index_cast %120 : i32 to index
    %c0_78 = arith.constant 0 : index
    %122 = vector.load %arg12[%121, %c0_78] : memref<128x32xf32, #tpu.memory_space<vmem>>, vector<8x32xf32>
    tpu.vector_store %arg12[%121, %c0_78], %119 {strides = array<i32>} : memref<128x32xf32, #tpu.memory_space<vmem>>, vector<8x32xf32>,
    %c8_i32_79 = arith.constant 8 : i32
    %123 = arith.muli %c12_i32, %c8_i32_79 : i32
    %124 = arith.index_cast %123 : i32 to index
    %c0_80 = arith.constant 0 : index
    %125 = vector.load %arg11[%124, %c0_80] : memref<128x56xf32, #tpu.memory_space<vmem>>, vector<8x56xf32>
    %126 = vector.extract_strided_slice %125 {offsets = [0, 0], sizes = [8, 32], strides = [1, 1]} : vector<8x56xf32> to vector<8x32xf32>
    %cst_81 = arith.constant dense<0.000000e+00> : vector<8x32xf32>
    %127 = tpu.matmul %119, %1, %cst_81 {dimension_numbers = #tpu.dot_dimension_numbers<[1], [0], [0], [1], [0, 0, 1, 1], [], []>} : vector<8x32xf32>, vector<32x32xf32>, vector<8x32xf32> -> vector<8x32xf32>
    %128 = arith.addf %126, %127 : vector<8x32xf32>
    %c13_i32 = arith.constant 13 : i32
    %c8_i32_82 = arith.constant 8 : i32
    %129 = arith.muli %c13_i32, %c8_i32_82 : i32
    %130 = arith.index_cast %129 : i32 to index
    %c0_83 = arith.constant 0 : index
    %131 = vector.load %arg12[%130, %c0_83] : memref<128x32xf32, #tpu.memory_space<vmem>>, vector<8x32xf32>
    tpu.vector_store %arg12[%130, %c0_83], %128 {strides = array<i32>} : memref<128x32xf32, #tpu.memory_space<vmem>>, vector<8x32xf32>,
    %c8_i32_84 = arith.constant 8 : i32
    %132 = arith.muli %c13_i32, %c8_i32_84 : i32
    %133 = arith.index_cast %132 : i32 to index
    %c0_85 = arith.constant 0 : index
    %134 = vector.load %arg11[%133, %c0_85] : memref<128x56xf32, #tpu.memory_space<vmem>>, vector<8x56xf32>
    %135 = vector.extract_strided_slice %134 {offsets = [0, 0], sizes = [8, 32], strides = [1, 1]} : vector<8x56xf32> to vector<8x32xf32>
    %cst_86 = arith.constant dense<0.000000e+00> : vector<8x32xf32>
    %136 = tpu.matmul %128, %1, %cst_86 {dimension_numbers = #tpu.dot_dimension_numbers<[1], [0], [0], [1], [0, 0, 1, 1], [], []>} : vector<8x32xf32>, vector<32x32xf32>, vector<8x32xf32> -> vector<8x32xf32>
    %137 = arith.addf %135, %136 : vector<8x32xf32>
    %c14_i32 = arith.constant 14 : i32
    %c8_i32_87 = arith.constant 8 : i32
    %138 = arith.muli %c14_i32, %c8_i32_87 : i32
    %139 = arith.index_cast %138 : i32 to index
    %c0_88 = arith.constant 0 : index
    %140 = vector.load %arg12[%139, %c0_88] : memref<128x32xf32, #tpu.memory_space<vmem>>, vector<8x32xf32>
    tpu.vector_store %arg12[%139, %c0_88], %137 {strides = array<i32>} : memref<128x32xf32, #tpu.memory_space<vmem>>, vector<8x32xf32>,
    %c8_i32_89 = arith.constant 8 : i32
    %141 = arith.muli %c14_i32, %c8_i32_89 : i32
    %142 = arith.index_cast %141 : i32 to index
    %c0_90 = arith.constant 0 : index
    %143 = vector.load %arg11[%142, %c0_90] : memref<128x56xf32, #tpu.memory_space<vmem>>, vector<8x56xf32>
    %144 = vector.extract_strided_slice %143 {offsets = [0, 0], sizes = [8, 32], strides = [1, 1]} : vector<8x56xf32> to vector<8x32xf32>
    %cst_91 = arith.constant dense<0.000000e+00> : vector<8x32xf32>
    %145 = tpu.matmul %137, %1, %cst_91 {dimension_numbers = #tpu.dot_dimension_numbers<[1], [0], [0], [1], [0, 0, 1, 1], [], []>} : vector<8x32xf32>, vector<32x32xf32>, vector<8x32xf32> -> vector<8x32xf32>
    %146 = arith.addf %144, %145 : vector<8x32xf32>
    %c15_i32 = arith.constant 15 : i32
    %c8_i32_92 = arith.constant 8 : i32
    %147 = arith.muli %c15_i32, %c8_i32_92 : i32
    %148 = arith.index_cast %147 : i32 to index
    %c0_93 = arith.constant 0 : index
    %149 = vector.load %arg12[%148, %c0_93] : memref<128x32xf32, #tpu.memory_space<vmem>>, vector<8x32xf32>
    tpu.vector_store %arg12[%148, %c0_93], %146 {strides = array<i32>} : memref<128x32xf32, #tpu.memory_space<vmem>>, vector<8x32xf32>,
    %c8_i32_94 = arith.constant 8 : i32
    %150 = arith.muli %c15_i32, %c8_i32_94 : i32
    %151 = arith.index_cast %150 : i32 to index
    %c0_95 = arith.constant 0 : index
    %152 = vector.load %arg11[%151, %c0_95] : memref<128x56xf32, #tpu.memory_space<vmem>>, vector<8x56xf32>
    %153 = vector.extract_strided_slice %152 {offsets = [0, 0], sizes = [8, 32], strides = [1, 1]} : vector<8x56xf32> to vector<8x32xf32>
    %cst_96 = arith.constant dense<0.000000e+00> : vector<8x32xf32>
    %154 = tpu.matmul %146, %1, %cst_96 {dimension_numbers = #tpu.dot_dimension_numbers<[1], [0], [0], [1], [0, 0, 1, 1], [], []>} : vector<8x32xf32>, vector<32x32xf32>, vector<8x32xf32> -> vector<8x32xf32>
    %155 = arith.addf %153, %154 : vector<8x32xf32>
    %c16_i32 = arith.constant 16 : i32
    %c0_97 = arith.constant 0 : index
    %c0_98 = arith.constant 0 : index
    %156 = vector.load %arg11[%c0_97, %c0_98] : memref<128x56xf32, #tpu.memory_space<vmem>>, vector<128x56xf32>
    %c0_99 = arith.constant 0 : index
    %c0_100 = arith.constant 0 : index
    %157 = vector.load %arg12[%c0_99, %c0_100] : memref<128x32xf32, #tpu.memory_space<vmem>>, vector<128x32xf32>
    %cst_101 = arith.constant dense<0.000000e+00> : vector<128x56xf32>
    %158 = tpu.matmul %157, %2, %cst_101 {dimension_numbers = #tpu.dot_dimension_numbers<[1], [0], [0], [1], [0, 0, 1, 1], [], []>} : vector<128x32xf32>, vector<32x56xf32>, vector<128x56xf32> -> vector<128x56xf32>
    %159 = arith.addf %156, %158 : vector<128x56xf32>
    %cst_102 = arith.constant dense<0.000000e+00> : vector<128x24xf32>
    %160 = tpu.matmul %159, %4, %cst_102 {dimension_numbers = #tpu.dot_dimension_numbers<[1], [0], [0], [1], [0, 0, 1, 1], [], []>} : vector<128x56xf32>, vector<56x24xf32>, vector<128x24xf32> -> vector<128x24xf32>
    %161 = vector.broadcast %5 : vector<1x24xf32> to vector<128x24xf32>
    %162 = arith.addf %160, %161 : vector<128x24xf32>
    %cst_103 = arith.constant dense<0xFF800000> : vector<128xf32>
    %163 = vector.multi_reduction <maximumf>, %162, %cst_103 [1] : vector<128x24xf32> to vector<128xf32>
    %164 = vector.shape_cast %163 : vector<128xf32> to vector<128x1xf32>
    %165 = vector.broadcast %164 : vector<128x1xf32> to vector<128x24xf32>
    %166 = arith.subf %162, %165 : vector<128x24xf32>
    %167 = math.exp %166 : vector<128x24xf32>
    %cst_104 = arith.constant dense<0.000000e+00> : vector<128xf32>
    %168 = vector.multi_reduction <add>, %167, %cst_104 [1] : vector<128x24xf32> to vector<128xf32>
    %169 = vector.shape_cast %168 : vector<128xf32> to vector<128x1xf32>
    %170 = math.log %169 : vector<128x1xf32>
    %171 = vector.broadcast %170 : vector<128x1xf32> to vector<128x24xf32>
    %172 = arith.subf %166, %171 : vector<128x24xf32>
    %c0_105 = arith.constant 0 : index
    %c0_106 = arith.constant 0 : index
    %173 = vector.load %arg9[%c0_105, %c0_106] : memref<128x24xf32, #tpu.memory_space<vmem>>, vector<128x24xf32>
    tpu.vector_store %arg9[%c0_105, %c0_106], %172 {strides = array<i32>} : memref<128x24xf32, #tpu.memory_space<vmem>>, vector<128x24xf32>,
    %c0_107 = arith.constant 0 : index
    %c0_108 = arith.constant 0 : index
    %174 = vector.load %arg10[%c0_107, %c0_108] : memref<8x32xf32, #tpu.memory_space<vmem>>, vector<8x32xf32>
    tpu.vector_store %arg10[%c0_107, %c0_108], %155 {strides = array<i32>} : memref<8x32xf32, #tpu.memory_space<vmem>>, vector<8x32xf32>,
    return
  }
  func.func @transform_0(%arg0: i32) -> (i32, i32) {
    %c0_i32 = arith.constant 0 : i32
    %c0_i32_0 = arith.constant 0 : i32
    %c0_i32_1 = arith.constant 0 : i32
    return %c0_i32, %c0_i32_0 : i32, i32
  }
  func.func @transform_1(%arg0: i32) -> (i32, i32) {
    %c0_i32 = arith.constant 0 : i32
    %c0_i32_0 = arith.constant 0 : i32
    %c0_i32_1 = arith.constant 0 : i32
    return %c0_i32, %c0_i32_0 : i32, i32
  }
  func.func @transform_2(%arg0: i32) -> (i32, i32) {
    %c0_i32 = arith.constant 0 : i32
    %c0_i32_0 = arith.constant 0 : i32
    %c0_i32_1 = arith.constant 0 : i32
    return %c0_i32, %c0_i32_0 : i32, i32
  }
  func.func @transform_3(%arg0: i32) -> (i32, i32) {
    %c0_i32 = arith.constant 0 : i32
    %c0_i32_0 = arith.constant 0 : i32
    %c0_i32_1 = arith.constant 0 : i32
    return %c0_i32, %c0_i32_0 : i32, i32
  }
  func.func @transform_4(%arg0: i32) -> (i32, i32) {
    %c0_i32 = arith.constant 0 : i32
    %c0_i32_0 = arith.constant 0 : i32
    %c0_i32_1 = arith.constant 0 : i32
    return %c0_i32, %c0_i32_0 : i32, i32
  }
  func.func @transform_5(%arg0: i32) -> (i32, i32) {
    %c0_i32 = arith.constant 0 : i32
    %c0_i32_0 = arith.constant 0 : i32
    %c0_i32_1 = arith.constant 0 : i32
    return %c0_i32, %c0_i32_0 : i32, i32
  }
  func.func @transform_6(%arg0: i32) -> (i32, i32) {
    %c0_i32 = arith.constant 0 : i32
    %c0_i32_0 = arith.constant 0 : i32
    %c0_i32_1 = arith.constant 0 : i32
    return %c0_i32, %c0_i32_0 : i32, i32
  }
  func.func @transform_7(%arg0: i32) -> (i32, i32) {
    %c0_i32 = arith.constant 0 : i32
    %c0_i32_0 = arith.constant 0 : i32
    %c0_i32_1 = arith.constant 0 : i32
    return %c0_i32, %c0_i32_0 : i32, i32
  }
  func.func @transform_8(%arg0: i32) -> (i32, i32) {
    %c0_i32 = arith.constant 0 : i32
    %c0_i32_0 = arith.constant 0 : i32
    %c0_i32_1 = arith.constant 0 : i32
    return %c0_i32, %c0_i32_0 : i32, i32
  }
  func.func @transform_9(%arg0: i32) -> (i32, i32) {
    %c0_i32 = arith.constant 0 : i32
    %c0_i32_0 = arith.constant 0 : i32
    %c0_i32_1 = arith.constant 0 : i32
    return %c0_i32, %c0_i32_0 : i32, i32
  }
}

</mosaic_0001>

<bundles_post_ra>
// kernel: rnn_forward_seq.1
= control target key start
LH: loop header
LB: loop body
LE: loop exit
PB: predicated region body
PF: predicated region fallthrough
CT: control target
= control target key end

     0   :  { %15 = vsyncpa [#allocation5], 0  ;;  %vm74_vm0 = vcmask 130048   ;;  %v2910_v4 = vmov 0.0|0.0   ;;  %vm2911_vm1 = vmmov 0   ;;  %v2912_v10 = vmov 0.0   ;;  %s3532_s0 = inlined_call_operand.vmem [shape: f32[128,16], index: 0, kind: input, shape index: {}]   ;;  %s3533_s1 = inlined_call_operand.vmem [shape: f32[8,32], index: 1, kind: input, shape index: {}]   ;;  %s3534_s2 = inlined_call_operand.vmem [shape: f32[16,56], index: 2, kind: input, shape index: {}]   ;;  %s3535_s3 = inlined_call_operand.vmem [shape: f32[32,32], index: 3, kind: input, shape index: {}]   ;;  %s3536_s4 = inlined_call_operand.vmem [shape: f32[32,56], index: 4, kind: input, shape index: {}]   ;;  %s3537_s5 = inlined_call_operand.vmem [shape: f32[1,56], index: 5, kind: input, shape index: {}]   ;;  %s3538_s6 = inlined_call_operand.vmem [shape: f32[56,24], index: 6, kind: input, shape index: {}]   ;;  %s3539_s7 = inlined_call_operand.vmem [shape: f32[1,24], index: 7, kind: input, shape index: {}]   ;;  %s3540_s8 = inlined_call_operand.hbm [shape: f32[128,24], index: 8, kind: output, shape index: {0}]   ;;  %s3541_s9 = inlined_call_operand.hbm [shape: f32[8,32], index: 9, kind: output, shape index: {1}]  }
   0x1   :  { %v33_v0 = vld [vmem:[%s3534_s2] sm:$0xff]  ;;  %v34_v1 = vld [vmem:[%s3534_s2 + $0x8] sm:$0xff]  ;;  %2667 = vmatprep.subr.bf16.mxu1 %v2910_v4  ;;  %v37_v8 = vld [vmem:[%s3535_s3 + $0x10] sm:$0xff]  ;;  %2425 = vmatprep.mubr.msk.f32.mxu1 %vm2911_vm1, %v2912_v10  ;;  %vm286_vm2 = vcmask 261120  }
   0x2   :  { %v52_v2 = vld [vmem:[%s3532_s0] sm:$0xff]  ;;  %v2663_v3 = vpack.c.bf16 %v34_v1, %v33_v0  ;;  %v36_v6 = vld [vmem:[%s3535_s3 + $0x8] sm:$0xff]  ;;  %v38_v9 = vld [vmem:[%s3535_s3 + $0x18] sm:$0xff] }
   0x3   :  { %2393 = vmatprep.mubr.msk.f32.mxu0 %vm74_vm0, %v52_v2  ;;  %v35_v5 = vld [vmem:[%s3535_s3] sm:$0xff] }
   0x4   :  { %v2984_v7 = vpack.c.bf16 %v36_v6, %v35_v5  ;;  %v285_v11 = vld [vmem:[%s3533_s1] sm:$0xff]  ;;  %2664 = vmatprep.subr.bf16.mxu0 %v2663_v3 }
   0x5   :  { %287 = vst.msk [vmem:[#allocation3] sm:$0xff] %vm286_vm2, %v285_v11 }
   0x6   :  { %16 = vsyncpa [#allocation7], 0  ;;  %2666 = vmatpush3.bf16.msra.mxu0 %v2663_v3  ;;  %v53_v12 = vld [vmem:[%s3532_s0 + $0x8] sm:$0xff]  ;;  %2669 = vmatpush3.bf16.msra.mxu1 %v2984_v7  ;;  %v3002_v13 = vpack.c.bf16 %v38_v9, %v37_v8  ;;  %v54_v14 = vld [vmem:[%s3532_s0 + $0x10] sm:$0xff]  ;;  %vm268_vm3 = vcmask 457728   ;;  %vm1942_vm4 = vcmask 195584  }
   0x7   :  { %2670 = vmatprep.subr.bf16.mxu1 %v2910_v4  ;;  %2691 = vmatprep.subr.bf16.mxu0 %v2910_v4  ;;  %v55_v15 = vld [vmem:[%s3532_s0 + $0x18] sm:$0xff]  ;;  %v3031_v16 = vld [vmem:[%s3537_s5] ss:$0 sm:$0xff]  ;;  %v57_v34 = vld [vmem:[%s3532_s0 + $0x28] sm:$0xff] }
   0x8   :  { %v56_v33 = vld [vmem:[%s3532_s0 + $0x20] sm:$0xff]  ;;  %v58_v35 = vld [vmem:[%s3532_s0 + $0x30] sm:$0xff]  ;;  %v59_v36 = vld [vmem:[%s3532_s0 + $0x38] sm:$0xff] }
   0x9   :  { %2394 = vmatmul.mubr.msk.f32.vlgmr.msra.gmra.mrb[0].mxu0 %vm74_vm0, %v53_v12  ;;  %v60_v37 = vld [vmem:[%s3532_s0 + $0x40] sm:$0xff]  ;;  %v61_v38 = vld [vmem:[%s3532_s0 + $0x48] sm:$0xff]  ;;  %v62_v39 = vld [vmem:[%s3532_s0 + $0x50] sm:$0xff] }
   0xa   :  { %2672 = vmatpush3.bf16.msra.mxu1 %v3002_v13  ;;  %2693 = vmatpush3.bf16.msra.mxu0 %v2984_v7  ;;  %v63_v40 = vld [vmem:[%s3532_s0 + $0x58] sm:$0xff]  ;;  %v64_v41 = vld [vmem:[%s3532_s0 + $0x60] sm:$0xff]  ;;  %v65_v42 = vld [vmem:[%s3532_s0 + $0x68] sm:$0xff] }
   0xb   :  { %2673 = vmatprep.subr.bf16.mxu1 %v2910_v4  ;;  %2694 = vmatprep.subr.bf16.mxu0 %v2910_v4  ;;  %v66_v43 = vld [vmem:[%s3532_s0 + $0x70] sm:$0xff]  ;;  %v67_v44 = vld [vmem:[%s3532_s0 + $0x78] sm:$0xff] }
   0xc   :  { %2396 = vmatprep.mubr.msk.f32.mxu0 %vm74_vm0, %v54_v14 }
   0xd   :  { %2426 = vmatmul.mubr.msk.f32.vlgmr.msra.gmra.mrb[0].mxu1 %vm286_vm2, %v285_v11  ;;  %2397 = vmatmul.mubr.msk.f32.gmra.mrb[2].mxu0 %vm74_vm0, %v55_v15 }
   0xe   :  { %2675 = vmatpush3.bf16.msra.mxu1 %v2984_v7  ;;  %2436 = vmatprep.mubr.msk.f32.mxu1 %vm2911_vm1, %v2912_v10 }
   0xf   :  { %2676 = vmatprep.subr.bf16.mxu1 %v2910_v4  ;;  %2696 = vmatpush3.bf16.msra.mxu0 %v3002_v13 }
  0x10   :  { %2703 = vmatprep.subr.bf16.mxu0 %v2910_v4  ;;  %2399 = vmatprep.mubr.msk.f32.mxu0 %vm74_vm0, %v56_v33 }
  0x11   :  { %2400 = vmatmul.mubr.msk.f32.gmra.mrb[4].mxu0 %vm74_vm0, %v57_v34 }
  0x12   :  { %2678 = vmatpush3.bf16.msra.mxu1 %v3002_v13  ;;  %2402 = vmatprep.mubr.msk.f32.mxu0 %vm74_vm0, %v58_v35 }
  0x13   :  { %2679 = vmatprep.subr.bf16.mxu1 %v2910_v4 }
  0x15   :  { %2403 = vmatmul.mubr.msk.f32.gmra.mrb[6].mxu0 %vm74_vm0, %v59_v36 }
  0x16   :  { %2405 = vmatprep.mubr.msk.f32.mxu0 %vm74_vm0, %v60_v37 }
  0x19   :  { %2406 = vmatmul.mubr.msk.f32.gmra.mrb[8].mxu0 %vm74_vm0, %v61_v38 }
  0x1a   :  { %2408 = vmatprep.mubr.msk.f32.mxu0 %vm74_vm0, %v62_v39 }
  0x1d   :  { %2409 = vmatmul.mubr.msk.f32.gmra.mrb[10].mxu0 %vm74_vm0, %v63_v40 }
  0x1e   :  { %2411 = vmatprep.mubr.msk.f32.mxu0 %vm74_vm0, %v64_v41 }
  0x21   :  { %2412 = vmatmul.mubr.msk.f32.gmra.mrb[12].mxu0 %vm74_vm0, %v65_v42 }
  0x22   :  { %2414 = vmatprep.mubr.msk.f32.mxu0 %vm74_vm0, %v66_v43 }
  0x25   :  { %2415 = vmatmul.mubr.msk.f32.gmra.mrb[14].mxu0 %vm74_vm0, %v67_v44 }
  0x26   :  { %2469 = vmatprep.mubr.msk.f32.mxu0 %vm2911_vm1, %v2912_v10 }
  0xdc   :  { %v2395_v17 = vpop.f32.mrb[0].mxu0 }
  0xdd   :  { %v195_v18 = vadd.f32 %v2395_v17, %v3031_v16  ;;  %v189_v19 = vpop.f32.mrb[1].mxu0 }
  0xde   :  { %v190_v20 = vadd.f32 %v3031_v16, %v189_v19 }
  0xdf   :  { %270 = vst.msk [vmem:[#allocation2 + $0x8] sm:$0xff] %vm268_vm3, %v195_v18 }
  0xe0   :  { %269 = vst.msk [vmem:[#allocation2] sm:$0xff] %vm268_vm3, %v190_v20  ;;  %v358_v21 = vpop.f32.mrb[0].mxu1  ;;  %v2398_v25 = vpop.f32.mrb[2].mxu0 }
  0xe1   :  { %v2427_v22 = vpop.f32.mrb[1].mxu1  ;;  %v205_v26 = vadd.f32 %v2398_v25, %v3031_v16  ;;  %v199_v27 = vpop.f32.mrb[3].mxu0 }
  0xe2   :  { %v200_v28 = vadd.f32 %v3031_v16, %v199_v27 }
  0xe3   :  { %272 = vst.msk [vmem:[#allocation2 + $0x18] sm:$0xff] %vm268_vm3, %v205_v26 }
  0xe4   :  { %271 = vst.msk [vmem:[#allocation2 + $0x10] sm:$0xff] %vm268_vm3, %v200_v28  ;;  %v2401_v49 = vpop.f32.mrb[4].mxu0 }
  0xe5   :  { %v215_v50 = vadd.f32 %v2401_v49, %v3031_v16  ;;  %v209_v51 = vpop.f32.mrb[5].mxu0 }
  0xe6   :  { %v3052_v29 = vld [vmem:[#allocation2 + $0x8] sm:$0xff]  ;;  %v210_v52 = vadd.f32 %v3031_v16, %v209_v51 }
  0xe7   :  { %v3037_v23 = vld [vmem:[#allocation2] sm:$0xff]  ;;  %274 = vst.msk [vmem:[#allocation2 + $0x28] sm:$0xff] %vm268_vm3, %v215_v50 }
  0xe8   :  { %v362_v24 = vadd.f32 %v358_v21, %v3037_v23  ;;  %v2404_v53 = vpop.f32.mrb[6].mxu0  ;;  %273 = vst.msk [vmem:[#allocation2 + $0x20] sm:$0xff] %vm268_vm3, %v210_v52 }
  0xe9   :  { %v225_v54 = vadd.f32 %v2404_v53, %v3031_v16  ;;  %v219_v55 = vpop.f32.mrb[7].mxu0 }
  0xea   :  { %363 = vst.msk [vmem:[#allocation3 + $0x8] sm:$0xff] %vm286_vm2, %v362_v24  ;;  %2437 = vmatmul.mubr.msk.f32.vlgmr.msra.gmra.mrb[2].mxu1 %vm286_vm2, %v362_v24  ;;  %v220_v56 = vadd.f32 %v3031_v16, %v219_v55  ;;  %v3148_v12 = vld [vmem:[#allocation2 + $0x18] sm:$0xff] }
  0xeb   :  { %2681 = vmatpush3.bf16.msra.mxu1 %v2984_v7  ;;  %2447 = vmatprep.mubr.msk.f32.mxu1 %vm2911_vm1, %v2912_v10  ;;  %v3113_v45 = vld [vmem:[#allocation2 + $0x10] sm:$0xff]  ;;  %276 = vst.msk [vmem:[#allocation2 + $0x38] sm:$0xff] %vm268_vm3, %v225_v54 }
  0xec   :  { %2682 = vmatprep.subr.bf16.mxu1 %v2910_v4  ;;  %275 = vst.msk [vmem:[#allocation2 + $0x30] sm:$0xff] %vm268_vm3, %v220_v56  ;;  %v2407_v57 = vpop.f32.mrb[8].mxu0  ;;  %v39_v56 = vld [vmem:[%s3536_s4] sm:$0xff] }
  0xed   :  { %v235_v58 = vadd.f32 %v2407_v57, %v3031_v16  ;;  %v229_v59 = vpop.f32.mrb[9].mxu0  ;;  %v40_v57 = vld [vmem:[%s3536_s4 + $0x8] sm:$0xff] }
  0xee   :  { %v230_v60 = vadd.f32 %v3031_v16, %v229_v59  ;;  %v3170_v21 = vld [vmem:[#allocation2 + $0x28] sm:$0xff] }
  0xef   :  { %2684 = vmatpush3.bf16.msra.mxu1 %v3002_v13  ;;  %278 = vst.msk [vmem:[#allocation2 + $0x48] sm:$0xff] %vm268_vm3, %v235_v58  ;;  %v2763_v58 = vpack.c.bf16 %v40_v57, %v39_v56 }
  0xf0   :  { %2685 = vmatprep.subr.bf16.mxu1 %v2910_v4  ;;  %277 = vst.msk [vmem:[#allocation2 + $0x40] sm:$0xff] %vm268_vm3, %v230_v60  ;;  %v2410_v61 = vpop.f32.mrb[10].mxu0 }
  0xf1   :  { %v245_v62 = vadd.f32 %v2410_v61, %v3031_v16  ;;  %v239_v63 = vpop.f32.mrb[11].mxu0 }
  0xf2   :  { %v240_v0 = vadd.f32 %v3031_v16, %v239_v63  ;;  %v1519_v63 = vld [vmem:[#allocation3 + $0x8] sm:$0xff] }
  0xf3   :  { %280 = vst.msk [vmem:[#allocation2 + $0x58] sm:$0xff] %vm268_vm3, %v245_v62  ;;  %v3181_v26 = vld [vmem:[#allocation2 + $0x30] sm:$0xff]  ;;  %v1518_v62 = vld [vmem:[#allocation3] sm:$0xff] }
  0xf4   :  { %279 = vst.msk [vmem:[#allocation2 + $0x50] sm:$0xff] %vm268_vm3, %v240_v0  ;;  %v2413_v1 = vpop.f32.mrb[12].mxu0 }
  0xf5   :  { %v255_v2 = vadd.f32 %v2413_v1, %v3031_v16  ;;  %v249_v3 = vpop.f32.mrb[13].mxu0 }
  0xf6   :  { %v250_v5 = vadd.f32 %v3031_v16, %v249_v3  ;;  %v3214_v39 = vld [vmem:[#allocation2 + $0x48] sm:$0xff] }
  0xf7   :  { %282 = vst.msk [vmem:[#allocation2 + $0x68] sm:$0xff] %vm268_vm3, %v255_v2  ;;  %v3203_v35 = vld [vmem:[#allocation2 + $0x40] sm:$0xff] }
  0xf8   :  { %281 = vst.msk [vmem:[#allocation2 + $0x60] sm:$0xff] %vm268_vm3, %v250_v5  ;;  %v2416_v6 = vpop.f32.mrb[14].mxu0 }
  0xf9   :  { %v265_v8 = vadd.f32 %v2416_v6, %v3031_v16  ;;  %v259_v9 = vpop.f32.mrb[15].mxu0 }
  0xfa   :  { %v260_v11 = vadd.f32 %v3031_v16, %v259_v9  ;;  %v3159_v16 = vld [vmem:[#allocation2 + $0x20] sm:$0xff] }
  0xfb   :  { %284 = vst.msk [vmem:[#allocation2 + $0x78] sm:$0xff] %vm268_vm3, %v265_v8  ;;  %v3225_v43 = vld [vmem:[#allocation2 + $0x50] sm:$0xff] }
  0xfc   :  { %283 = vst.msk [vmem:[#allocation2 + $0x70] sm:$0xff] %vm268_vm3, %v260_v11 }
  0xff   :  { %v3246_v52 = vld [vmem:[#allocation2 + $0x60] sm:$0xff] }
 0x1bd   :  { %v434_v30 = vpop.f32.mrb[2].mxu1 }
 0x1be   :  { %v438_v31 = vadd.f32 %v434_v30, %v3052_v29  ;;  %v2438_v32 = vpop.f32.mrb[3].mxu1 }
 0x1c0   :  { %439 = vst.msk [vmem:[#allocation3 + $0x10] sm:$0xff] %vm286_vm2, %v438_v31  ;;  %2448 = vmatmul.mubr.msk.f32.vlgmr.msra.gmra.mrb[4].mxu1 %vm286_vm2, %v438_v31  ;;  %v3192_v31 = vld [vmem:[#allocation2 + $0x38] sm:$0xff] }
 0x1c1   :  { %2687 = vmatpush3.bf16.msra.mxu1 %v2984_v7  ;;  %2458 = vmatprep.mubr.msk.f32.mxu1 %vm2911_vm1, %v2912_v10 }
 0x1c2   :  { %2688 = vmatprep.subr.bf16.mxu1 %v2910_v4 }
 0x1c5   :  { %2690 = vmatpush3.bf16.msra.mxu1 %v3002_v13 }
 0x1c6   :  { %2697 = vmatprep.subr.bf16.mxu1 %v2910_v4 }
 0x1c7   :  { %v1520_v0 = vld [vmem:[#allocation3 + $0x10] sm:$0xff] }
 0x293   :  { %v510_v46 = vpop.f32.mrb[4].mxu1 }
 0x294   :  { %v514_v47 = vadd.f32 %v510_v46, %v3113_v45  ;;  %v2449_v48 = vpop.f32.mrb[5].mxu1 }
 0x295   :  { %v3236_v48 = vld [vmem:[#allocation2 + $0x58] sm:$0xff] }
 0x296   :  { %515 = vst.msk [vmem:[#allocation3 + $0x18] sm:$0xff] %vm286_vm2, %v514_v47  ;;  %2459 = vmatmul.mubr.msk.f32.vlgmr.msra.gmra.mrb[6].mxu1 %vm286_vm2, %v514_v47 }
 0x297   :  { %2699 = vmatpush3.bf16.msra.mxu1 %v2984_v7  ;;  %2480 = vmatprep.mubr.msk.f32.mxu1 %vm2911_vm1, %v2912_v10 }
 0x298   :  { %2700 = vmatprep.subr.bf16.mxu1 %v2910_v4 }
 0x29b   :  { %2702 = vmatpush3.bf16.msra.mxu1 %v3002_v13 }
 0x29c   :  { %2709 = vmatprep.subr.bf16.mxu1 %v2910_v4 }
 0x29d   :  { %v1521_v1 = vld [vmem:[#allocation3 + $0x18] sm:$0xff] }
 0x369   :  { %v586_v14 = vpop.f32.mrb[6].mxu1 }
 0x36a   :  { %v590_v15 = vadd.f32 %v586_v14, %v3148_v12  ;;  %v2460_v17 = vpop.f32.mrb[7].mxu1 }
 0x36c   :  { %591 = vst.msk [vmem:[#allocation3 + $0x20] sm:$0xff] %vm286_vm2, %v590_v15  ;;  %2470 = vmatmul.mubr.msk.f32.vlgmr.msra.gmra.mrb[16].mxu0 %vm286_vm2, %v590_v15 }
 0x36d   :  { %2705 = vmatpush3.bf16.msra.mxu0 %v2984_v7  ;;  %2491 = vmatprep.mubr.msk.f32.mxu0 %vm2911_vm1, %v2912_v10 }
 0x36e   :  { %2706 = vmatprep.subr.bf16.mxu0 %v2910_v4 }
 0x371   :  { %2708 = vmatpush3.bf16.msra.mxu0 %v3002_v13 }
 0x372   :  { %2715 = vmatprep.subr.bf16.mxu0 %v2910_v4 }
 0x373   :  { %v1522_v2 = vld [vmem:[#allocation3 + $0x20] sm:$0xff] }
 0x43f   :  { %v662_v18 = vpop.f32.mrb[16].mxu0 }
 0x440   :  { %v666_v19 = vadd.f32 %v662_v18, %v3159_v16  ;;  %v2471_v20 = vpop.f32.mrb[17].mxu0 }
 0x441   :  { %v45_v20 = vld [vmem:[%s3538_s6 + $0x8] sm:$0xff] }
 0x442   :  { %667 = vst.msk [vmem:[#allocation3 + $0x28] sm:$0xff] %vm286_vm2, %v666_v19  ;;  %2481 = vmatmul.mubr.msk.f32.vlgmr.msra.gmra.mrb[8].mxu1 %vm286_vm2, %v666_v19  ;;  %v44_v19 = vld [vmem:[%s3538_s6] sm:$0xff] }
 0x443   :  { %2711 = vmatpush3.bf16.msra.mxu1 %v2984_v7  ;;  %2502 = vmatprep.mubr.msk.f32.mxu1 %vm2911_vm1, %v2912_v10 }
 0x444   :  { %2712 = vmatprep.subr.bf16.mxu1 %v2910_v4 }
 0x447   :  { %2714 = vmatpush3.bf16.msra.mxu1 %v3002_v13 }
 0x448   :  { %2721 = vmatprep.subr.bf16.mxu1 %v2910_v4 }
 0x449   :  { %v1523_v3 = vld [vmem:[#allocation3 + $0x28] sm:$0xff] }
 0x515   :  { %v738_v22 = vpop.f32.mrb[8].mxu1 }
 0x516   :  { %v742_v24 = vadd.f32 %v738_v22, %v3170_v21  ;;  %v2482_v25 = vpop.f32.mrb[9].mxu1  ;;  %v2771_v22 = vpack.c.bf16 %v45_v20, %v44_v19 }
 0x517   :  { %v47_v25 = vld [vmem:[%s3538_s6 + $0x18] sm:$0xff] }
 0x518   :  { %743 = vst.msk [vmem:[#allocation3 + $0x30] sm:$0xff] %vm286_vm2, %v742_v24  ;;  %2492 = vmatmul.mubr.msk.f32.vlgmr.msra.gmra.mrb[18].mxu0 %vm286_vm2, %v742_v24  ;;  %v46_v24 = vld [vmem:[%s3538_s6 + $0x10] sm:$0xff] }
 0x519   :  { %2717 = vmatpush3.bf16.msra.mxu0 %v2984_v7  ;;  %2513 = vmatprep.mubr.msk.f32.mxu0 %vm2911_vm1, %v2912_v10 }
 0x51a   :  { %2718 = vmatprep.subr.bf16.mxu0 %v2910_v4 }
 0x51d   :  { %2720 = vmatpush3.bf16.msra.mxu0 %v3002_v13 }
 0x51e   :  { %2727 = vmatprep.subr.bf16.mxu0 %v2910_v4 }
 0x51f   :  { %v1524_v5 = vld [vmem:[#allocation3 + $0x30] sm:$0xff] }
 0x5eb   :  { %v814_v27 = vpop.f32.mrb[18].mxu0 }
 0x5ec   :  { %v818_v28 = vadd.f32 %v814_v27, %v3181_v26  ;;  %v2493_v30 = vpop.f32.mrb[19].mxu0  ;;  %v2775_v27 = vpack.c.bf16 %v47_v25, %v46_v24 }
 0x5ed   :  { %v49_v30 = vld [vmem:[%s3538_s6 + $0x28] sm:$0xff] }
 0x5ee   :  { %819 = vst.msk [vmem:[#allocation3 + $0x38] sm:$0xff] %vm286_vm2, %v818_v28  ;;  %2503 = vmatmul.mubr.msk.f32.vlgmr.msra.gmra.mrb[10].mxu1 %vm286_vm2, %v818_v28  ;;  %v48_v28 = vld [vmem:[%s3538_s6 + $0x20] sm:$0xff] }
 0x5ef   :  { %2723 = vmatpush3.bf16.msra.mxu1 %v2984_v7  ;;  %2524 = vmatprep.mubr.msk.f32.mxu1 %vm2911_vm1, %v2912_v10 }
 0x5f0   :  { %2724 = vmatprep.subr.bf16.mxu1 %v2910_v4 }
 0x5f3   :  { %2726 = vmatpush3.bf16.msra.mxu1 %v3002_v13 }
 0x5f4   :  { %2733 = vmatprep.subr.bf16.mxu1 %v2910_v4 }
 0x5f5   :  { %v1525_v6 = vld [vmem:[#allocation3 + $0x38] sm:$0xff] }
 0x6c1   :  { %v890_v32 = vpop.f32.mrb[10].mxu1 }
 0x6c2   :  { %v894_v33 = vadd.f32 %v890_v32, %v3192_v31  ;;  %v2504_v34 = vpop.f32.mrb[11].mxu1  ;;  %v2779_v32 = vpack.c.bf16 %v49_v30, %v48_v28 }
 0x6c3   :  { %v3309_v34 = vld [vmem:[#allocation2 + $0x70] sm:$0xff] }
 0x6c4   :  { %895 = vst.msk [vmem:[#allocation3 + $0x40] sm:$0xff] %vm286_vm2, %v894_v33  ;;  %2514 = vmatmul.mubr.msk.f32.vlgmr.msra.gmra.mrb[20].mxu0 %vm286_vm2, %v894_v33  ;;  %v50_v33 = vld [vmem:[%s3538_s6 + $0x30] sm:$0xff] }
 0x6c5   :  { %2729 = vmatpush3.bf16.msra.mxu0 %v2984_v7  ;;  %2535 = vmatprep.mubr.msk.f32.mxu0 %vm2911_vm1, %v2912_v10 }
 0x6c6   :  { %2730 = vmatprep.subr.bf16.mxu0 %v2910_v4 }
 0x6c9   :  { %2732 = vmatpush3.bf16.msra.mxu0 %v3002_v13 }
 0x6ca   :  { %2739 = vmatprep.subr.bf16.mxu0 %v2910_v4 }
 0x6cb   :  { %v1526_v8 = vld [vmem:[#allocation3 + $0x40] sm:$0xff] }
 0x797   :  { %v966_v36 = vpop.f32.mrb[20].mxu0 }
 0x798   :  { %v970_v37 = vadd.f32 %v966_v36, %v3203_v35  ;;  %v2515_v38 = vpop.f32.mrb[21].mxu0 }
 0x79a   :  { %971 = vst.msk [vmem:[#allocation3 + $0x48] sm:$0xff] %vm286_vm2, %v970_v37  ;;  %2525 = vmatmul.mubr.msk.f32.vlgmr.msra.gmra.mrb[12].mxu1 %vm286_vm2, %v970_v37 }
 0x79b   :  { %2735 = vmatpush3.bf16.msra.mxu1 %v2984_v7  ;;  %2546 = vmatprep.mubr.msk.f32.mxu1 %vm2911_vm1, %v2912_v10 }
 0x79c   :  { %2736 = vmatprep.subr.bf16.mxu1 %v2910_v4 }
 0x79f   :  { %2738 = vmatpush3.bf16.msra.mxu1 %v3002_v13 }
 0x7a0   :  { %2745 = vmatprep.subr.bf16.mxu1 %v2910_v4 }
 0x7a1   :  { %v1527_v9 = vld [vmem:[#allocation3 + $0x48] sm:$0xff] }
 0x86d   :  { %v1042_v40 = vpop.f32.mrb[12].mxu1 }
 0x86e   :  { %v1046_v41 = vadd.f32 %v1042_v40, %v3214_v39  ;;  %v2526_v42 = vpop.f32.mrb[13].mxu1 }
 0x870   :  { %1047 = vst.msk [vmem:[#allocation3 + $0x50] sm:$0xff] %vm286_vm2, %v1046_v41  ;;  %2536 = vmatmul.mubr.msk.f32.vlgmr.msra.gmra.mrb[22].mxu0 %vm286_vm2, %v1046_v41 }
 0x871   :  { %2741 = vmatpush3.bf16.msra.mxu0 %v2984_v7  ;;  %2557 = vmatprep.mubr.msk.f32.mxu0 %vm2911_vm1, %v2912_v10 }
 0x872   :  { %2742 = vmatprep.subr.bf16.mxu0 %v2910_v4 }
 0x875   :  { %2744 = vmatpush3.bf16.msra.mxu0 %v3002_v13 }
 0x876   :  { %2751 = vmatprep.subr.bf16.mxu0 %v2910_v4 }
 0x877   :  { %v1528_v11 = vld [vmem:[#allocation3 + $0x50] sm:$0xff] }
 0x943   :  { %v1118_v44 = vpop.f32.mrb[22].mxu0 }
 0x944   :  { %v1122_v46 = vadd.f32 %v1118_v44, %v3225_v43  ;;  %v2537_v47 = vpop.f32.mrb[23].mxu0 }
 0x946   :  { %1123 = vst.msk [vmem:[#allocation3 + $0x58] sm:$0xff] %vm286_vm2, %v1122_v46  ;;  %2547 = vmatmul.mubr.msk.f32.vlgmr.msra.gmra.mrb[14].mxu1 %vm286_vm2, %v1122_v46 }
 0x947   :  { %2747 = vmatpush3.bf16.msra.mxu1 %v2984_v7  ;;  %2568 = vmatprep.mubr.msk.f32.mxu1 %vm2911_vm1, %v2912_v10 }
 0x948   :  { %2748 = vmatprep.subr.bf16.mxu1 %v2910_v4 }
 0x94b   :  { %2750 = vmatpush3.bf16.msra.mxu1 %v3002_v13 }
 0x94c   :  { %2757 = vmatprep.subr.bf16.mxu1 %v2910_v4 }
 0x94d   :  { %v1529_v14 = vld [vmem:[#allocation3 + $0x58] sm:$0xff] }
 0xa19   :  { %v1194_v49 = vpop.f32.mrb[14].mxu1 }
 0xa1a   :  { %v1198_v50 = vadd.f32 %v1194_v49, %v3236_v48  ;;  %v2548_v51 = vpop.f32.mrb[15].mxu1 }
 0xa1c   :  { %1199 = vst.msk [vmem:[#allocation3 + $0x60] sm:$0xff] %vm286_vm2, %v1198_v50  ;;  %2558 = vmatmul.mubr.msk.f32.vlgmr.msra.gmra.mrb[24].mxu0 %vm286_vm2, %v1198_v50 }
 0xa1d   :  { %2753 = vmatpush3.bf16.msra.mxu0 %v2984_v7  ;;  %2579 = vmatprep.mubr.msk.f32.mxu0 %vm2911_vm1, %v2912_v10 }
 0xa1e   :  { %2754 = vmatprep.subr.bf16.mxu0 %v2910_v4 }
 0xa21   :  { %2756 = vmatpush3.bf16.msra.mxu0 %v3002_v13 }
 0xa22   :  { %2764 = vmatprep.subr.bf16.mxu0 %v2763_v58 }
 0xa23   :  { %v1530_v15 = vld [vmem:[#allocation3 + $0x60] sm:$0xff] }
 0xaef   :  { %v1270_v53 = vpop.f32.mrb[24].mxu0 }
 0xaf0   :  { %v1274_v54 = vadd.f32 %v1270_v53, %v3246_v52  ;;  %v2559_v55 = vpop.f32.mrb[25].mxu0 }
 0xaf2   :  { %1275 = vst.msk [vmem:[#allocation3 + $0x68] sm:$0xff] %vm286_vm2, %v1274_v54  ;;  %2569 = vmatmul.mubr.msk.f32.vlgmr.msra.gmra.mrb[16].mxu1 %vm286_vm2, %v1274_v54 }
 0xaf3   :  { %2759 = vmatpush3.bf16.msra.mxu1 %v2984_v7  ;;  %2590 = vmatprep.mubr.msk.f32.mxu1 %vm2911_vm1, %v2912_v10  ;;  %v41_v7 = vld [vmem:[%s3536_s4 + $0x10] sm:$0xff]  ;;  %v3268_v10 = vld [vmem:[#allocation2 + $0x68] sm:$0xff] }
 0xaf4   :  { %2760 = vmatprep.subr.bf16.mxu1 %v2910_v4  ;;  %v42_v4 = vld [vmem:[%s3536_s4 + $0x18] sm:$0xff] }
 0xaf5   :  { %v2767_v61 = vpack.c.bf16 %v42_v4, %v41_v7 }
 0xaf7   :  { %2762 = vmatpush3.bf16.msra.mxu1 %v3002_v13 }
 0xaf8   :  { %2783 = vmatprep.subr.bf16.mxu1 %v2771_v22 }
 0xaf9   :  { %v1531_v17 = vld [vmem:[#allocation3 + $0x68] sm:$0xff] }
 0xbc5   :  { %v1346_v13 = vpop.f32.mrb[16].mxu1 }
 0xbc6   :  { %v1350_v59 = vadd.f32 %v1346_v13, %v3268_v10  ;;  %v2570_v60 = vpop.f32.mrb[17].mxu1 }
 0xbc7   :  { %v1428_v60 = vld [vmem:[#allocation2 + $0x78] sm:$0xff] }
 0xbc8   :  { %1351 = vst.msk [vmem:[#allocation3 + $0x70] sm:$0xff] %vm286_vm2, %v1350_v59  ;;  %2580 = vmatmul.mubr.msk.f32.vlgmr.msra.gmra.mrb[26].mxu0 %vm286_vm2, %v1350_v59 }
 0xbc9   :  { %2766 = vmatpush3.bf16.msra.mxu0 %v2763_v58  ;;  %2601 = vmatprep.mubr.msk.f32.mxu0 %vm286_vm2, %v1518_v62 }
 0xbca   :  { %2768 = vmatprep.subr.bf16.mxu0 %v2767_v61 }
 0xbcd   :  { %2770 = vmatpush3.bf16.msra.mxu0 %v2767_v61 }
 0xbce   :  { %2772 = vmatprep.subr.bf16.mxu0 %v2771_v22 }
 0xbcf   :  { %v1532_v18 = vld [vmem:[#allocation3 + $0x70] sm:$0xff] }
 0xbd0   :  { %2602 = vmatmul.mubr.msk.f32.vlgmr.msra.gmra.mrb[28].mxu0 %vm286_vm2, %v1519_v63 }
 0xbd1   :  { %2604 = vmatprep.mubr.msk.f32.mxu0 %vm286_vm2, %v1520_v0  ;;  %2774 = vmatpush3.bf16.msra.mxu0 %v2771_v22 }
 0xbd2   :  { %2776 = vmatprep.subr.bf16.mxu0 %v2775_v27 }
 0xbd4   :  { %2605 = vmatmul.mubr.msk.f32.gmra.mrb[30].mxu0 %vm286_vm2, %v1521_v1 }
 0xbd5   :  { %2607 = vmatprep.mubr.msk.f32.mxu0 %vm286_vm2, %v1522_v2  ;;  %2778 = vmatpush3.bf16.msra.mxu0 %v2775_v27 }
 0xbd6   :  { %2780 = vmatprep.subr.bf16.mxu0 %v2779_v32 }
 0xbd8   :  { %2608 = vmatmul.mubr.msk.f32.gmra.mrb[32].mxu0 %vm286_vm2, %v1523_v3 }
 0xbd9   :  { %2610 = vmatprep.mubr.msk.f32.mxu0 %vm286_vm2, %v1524_v5  ;;  %2782 = vmatpush3.bf16.msra.mxu0 %v2779_v32 }
 0xbda   :  { %2637 = vmatprep.subr.mxu0 %v50_v33 }
 0xbdc   :  { %2611 = vmatmul.mubr.msk.f32.gmra.mrb[34].mxu0 %vm286_vm2, %v1525_v6 }
 0xbdd   :  { %2613 = vmatprep.mubr.msk.f32.mxu0 %vm286_vm2, %v1526_v8  ;;  %2638 = vmatpush3.msra.mxu0 %v50_v33 }
 0xbe0   :  { %2614 = vmatmul.mubr.msk.f32.gmra.mrb[36].mxu0 %vm286_vm2, %v1527_v9 }
 0xbe1   :  { %2616 = vmatprep.mubr.msk.f32.mxu0 %vm286_vm2, %v1528_v11 }
 0xbe4   :  { %2617 = vmatmul.mubr.msk.f32.gmra.mrb[38].mxu0 %vm286_vm2, %v1529_v14 }
 0xbe5   :  { %2619 = vmatprep.mubr.msk.f32.mxu0 %vm286_vm2, %v1530_v15 }
 0xbe8   :  { %2620 = vmatmul.mubr.msk.f32.gmra.mrb[40].mxu0 %vm286_vm2, %v1531_v17 }
 0xbe9   :  { %2622 = vmatprep.mubr.msk.f32.mxu0 %vm286_vm2, %v1532_v18 }
 0xc9b   :  { %v1422_v36 = vpop.f32.mrb[26].mxu0 }
 0xc9c   :  { %v1426_v37 = vadd.f32 %v1422_v36, %v3309_v34  ;;  %v2581_v38 = vpop.f32.mrb[27].mxu0 }
 0xc9e   :  { %1427 = vst.msk [vmem:[#allocation3 + $0x78] sm:$0xff] %vm286_vm2, %v1426_v37  ;;  %2591 = vmatmul.mubr.msk.f32.vlgmr.msra.gmra.mrb[18].mxu1 %vm286_vm2, %v1426_v37 }
 0xc9f   :  { %2787 = vmatpush3.bf16.msra.mxu1 %v2771_v22 }
 0xca0   :  { %2784 = vmatprep.subr.bf16.mxu1 %v2775_v27 }
 0xca3   :  { %v2603_v40 = vpop.f32.mrb[28].mxu0  ;;  %2788 = vmatpush3.bf16.msra.mxu1 %v2775_v27 }
 0xca4   :  { %v1648_v41 = vpop.f32.mrb[29].mxu0  ;;  %2785 = vmatprep.subr.bf16.mxu1 %v2779_v32  ;;  %v1728_v47 = vadd.f32 %v2603_v40, %v3052_v29 }
 0xca5   :  { %v1727_v42 = vadd.f32 %v1648_v41, %v3037_v23  ;;  %v1533_v44 = vld [vmem:[#allocation3 + $0x78] sm:$0xff] }
 0xca6   :  { %2623 = vmatmul.mubr.msk.f32.gmra.mrb[42].mxu0 %vm286_vm2, %v1533_v44 }
 0xca7   :  { %v2606_v46 = vpop.f32.mrb[30].mxu0  ;;  %2789 = vmatpush3.bf16.msra.mxu1 %v2779_v32  ;;  %2639 = vmatprep.mubr.msk.f32.mxu0 %vm268_vm3, %v1727_v42 }
 0xca8   :  { %v1658_v49 = vpop.f32.mrb[31].mxu0  ;;  %2786 = vmatprep.subr.mxu1 %v50_v33  ;;  %v1730_v51 = vadd.f32 %v2606_v46, %v3148_v12 }
 0xca9   :  { %v1729_v50 = vadd.f32 %v1658_v49, %v3113_v45 }
 0xcaa   :  { %2640 = vmatmul.mubr.msk.f32.vlgmr.msra.gmra.mrb[44].mxu0 %vm268_vm3, %v1728_v47 }
 0xcab   :  { %v2609_v53 = vpop.f32.mrb[32].mxu0  ;;  %2790 = vmatpush3.msra.mxu1 %v50_v33  ;;  %2642 = vmatprep.mubr.msk.f32.mxu1 %vm268_vm3, %v1729_v50 }
 0xcac   :  { %v1668_v23 = vpop.f32.mrb[33].mxu0  ;;  %2643 = vmatmul.mubr.msk.f32.vlgmr.msra.gmra.mrb[20].mxu1 %vm268_vm3, %v1730_v51  ;;  %v1732_v55 = vadd.f32 %v2609_v53, %v3170_v21 }
 0xcad   :  { %v1731_v54 = vadd.f32 %v1668_v23, %v3159_v16 }
 0xcaf   :  { %v2612_v29 = vpop.f32.mrb[34].mxu0  ;;  %2645 = vmatprep.mubr.msk.f32.mxu1 %vm268_vm3, %v1731_v54 }
 0xcb0   :  { %v1678_v56 = vpop.f32.mrb[35].mxu0  ;;  %2646 = vmatmul.mubr.msk.f32.gmra.mrb[22].mxu1 %vm268_vm3, %v1732_v55  ;;  %v1734_v12 = vadd.f32 %v2612_v29, %v3192_v31 }
 0xcb1   :  { %v1733_v45 = vadd.f32 %v1678_v56, %v3181_v26 }
 0xcb3   :  { %v2615_v57 = vpop.f32.mrb[36].mxu0  ;;  %2648 = vmatprep.mubr.msk.f32.mxu1 %vm268_vm3, %v1733_v45 }
 0xcb4   :  { %v1688_v58 = vpop.f32.mrb[37].mxu0  ;;  %2649 = vmatmul.mubr.msk.f32.gmra.mrb[24].mxu1 %vm268_vm3, %v1734_v12  ;;  %v1736_v21 = vadd.f32 %v2615_v57, %v3214_v39 }
 0xcb5   :  { %v1735_v16 = vadd.f32 %v1688_v58, %v3203_v35 }
 0xcb7   :  { %v2618_v7 = vpop.f32.mrb[38].mxu0  ;;  %2651 = vmatprep.mubr.msk.f32.mxu1 %vm268_vm3, %v1735_v16 }
 0xcb8   :  { %v1698_v4 = vpop.f32.mrb[39].mxu0  ;;  %2652 = vmatmul.mubr.msk.f32.gmra.mrb[26].mxu1 %vm268_vm3, %v1736_v21  ;;  %v1738_v31 = vadd.f32 %v2618_v7, %v3236_v48 }
 0xcb9   :  { %v1737_v26 = vadd.f32 %v1698_v4, %v3225_v43 }
 0xcbb   :  { %v2621_v13 = vpop.f32.mrb[40].mxu0  ;;  %2654 = vmatprep.mubr.msk.f32.mxu1 %vm268_vm3, %v1737_v26 }
 0xcbc   :  { %v1708_v59 = vpop.f32.mrb[41].mxu0  ;;  %2655 = vmatmul.mubr.msk.f32.gmra.mrb[28].mxu1 %vm268_vm3, %v1738_v31  ;;  %v1740_v39 = vadd.f32 %v2621_v13, %v3268_v10 }
 0xcbd   :  { %v1739_v35 = vadd.f32 %v1708_v59, %v3246_v52  ;;  %v3348_v52 = vld [vmem:[%s3539_s7] ss:$0 sm:$0xff]  ;;  %s2913_s7 = smov [#allocation6]  }
 0xcbe   :  { %s2170_s3 = sshll.u32 %s2913_s7, 4  ;;  %s2171_s3 = int_to_ptr.vmem [resolvable:$true] %s2170_s3 }
 0xcbf   :  { %2657 = vmatprep.mubr.msk.f32.mxu1 %vm268_vm3, %v1739_v35  ;;  %s2862_s26 = scalar_lea.vmem %s2171_s3, 128  ;;  %p2867_p1 = scmp.lt.s32.totalorder %s2171_s3, %s2171_s3 }
 0xcc0   :  { %2658 = vmatmul.mubr.msk.f32.gmra.mrb[30].mxu1 %vm268_vm3, %v1740_v39  ;;  %p2863_p0 = scmp.ne.s32.totalorder %s2171_s3, %s2862_s26  ;;  %p2868_p2 = scmp.lt.s32.totalorder %s2862_s26, %s2862_s26 }
 0xcc2   :  { %p2869_p3 = por %p2868_p2, %p2867_p1 }
 0xcc4   :  { %p2870_p4 = pnand %p2869_p3, %p2863_p0 }
 0xd71   :  { %v1498_v61 = vpop.f32.mrb[18].mxu1 }
 0xd72   :  { %v1502_v62 = vadd.f32 %v1498_v61, %v1428_v60  ;;  %v2592_v43 = vpop.f32.mrb[19].mxu1 }
 0xd74   :  { %2151 = vst.msk [vmem:[#allocation6] sm:$0xff] %vm286_vm2, %v1502_v62 }
 0xd79   :  { %v2624_v48 = vpop.f32.mrb[42].mxu0 }
 0xd7a   :  { %v1718_v63 = vpop.f32.mrb[43].mxu0  ;;  %v1742_v10 = vadd.f32 %v2624_v48, %v1428_v60 }
 0xd7b   :  { %v1741_v0 = vadd.f32 %v1718_v63, %v3309_v34 }
 0xd7d   :  { %v2641_v1 = vpop.f32.mrb[44].mxu0  ;;  %2660 = vmatprep.mubr.msk.f32.mxu1 %vm268_vm3, %v1741_v0 }
 0xd7e   :  { %v1869_v2 = vadd.f32 %v2641_v1, %v3348_v52  ;;  %v1863_v3 = vpop.f32.mrb[45].mxu0  ;;  %2661 = vmatmul.mubr.msk.f32.gmra.mrb[32].mxu1 %vm268_vm3, %v1742_v10 }
 0xd7f   :  { %v2644_v5 = vpop.f32.mrb[20].mxu1  ;;  %v1864_v6 = vadd.f32 %v3348_v52, %v1863_v3 }
 0xd80   :  { %v1879_v8 = vadd.f32 %v2644_v5, %v3348_v52  ;;  %v1873_v9 = vpop.f32.mrb[21].mxu1  ;;  %v1946_v11 = vsel %vm1942_vm4, %v1869_v2, -inf }
 0xd81   :  { %1947 = vmax.xlane.f32.xlu0 %v1946_v11  ;;  %v1874_v14 = vadd.f32 %v3348_v52, %v1873_v9  ;;  %v1943_v19 = vsel %vm1942_vm4, %v1864_v6, -inf }
 0xd82   :  { %v1952_v15 = vsel %vm1942_vm4, %v1879_v8, -inf }
 0xd83   :  { %1953 = vmax.xlane.f32.xlu1 %v1952_v15  ;;  %v2647_v17 = vpop.f32.mrb[22].mxu1  ;;  %v1949_v24 = vsel %vm1942_vm4, %v1874_v14, -inf }
 0xd84   :  { %v1883_v18 = vpop.f32.mrb[23].mxu1  ;;  %v1889_v22 = vadd.f32 %v2647_v17, %v3348_v52 }
 0xd85   :  { %v1884_v20 = vadd.f32 %v3348_v52, %v1883_v18  ;;  %1944 = vmax.xlane.f32.xlu0 %v1943_v19 }
 0xd86   :  { %v1958_v33 = vsel %vm1942_vm4, %v1889_v22, -inf }
 0xd87   :  { %1950 = vmax.xlane.f32.xlu1 %v1949_v24  ;;  %v2650_v25 = vpop.f32.mrb[24].mxu1  ;;  %v1955_v28 = vsel %vm1942_vm4, %v1884_v20, -inf }
 0xd88   :  { %v1893_v27 = vpop.f32.mrb[25].mxu1  ;;  %v1899_v32 = vadd.f32 %v2650_v25, %v3348_v52 }
 0xd89   :  { %v1894_v30 = vadd.f32 %v3348_v52, %v1893_v27  ;;  %1956 = vmax.xlane.f32.xlu0 %v1955_v28 }
 0xd8a   :  { %v1964_v41 = vsel %vm1942_vm4, %v1899_v32, -inf }
 0xd8b   :  { %1959 = vmax.xlane.f32.xlu1 %v1958_v33  ;;  %v2653_v34 = vpop.f32.mrb[26].mxu1  ;;  %v1961_v37 = vsel %vm1942_vm4, %v1894_v30, -inf }
 0xd8c   :  { %v1903_v36 = vpop.f32.mrb[27].mxu1  ;;  %v1909_v40 = vadd.f32 %v2653_v34, %v3348_v52 }
 0xd8d   :  { %v3368_v38 = vadd.f32 %v3348_v52, %v1903_v36  ;;  %1962 = vmax.xlane.f32.xlu0 %v1961_v37 }
 0xd8e   :  { %v1970_v50 = vsel %vm1942_vm4, %v1909_v40, -inf }
 0xd8f   :  { %1965 = vmax.xlane.f32.xlu1 %v1964_v41  ;;  %v2656_v42 = vpop.f32.mrb[28].mxu1  ;;  %v1967_v46 = vsel %vm1942_vm4, %v3368_v38, -inf }
 0xd90   :  { %v1913_v44 = vpop.f32.mrb[29].mxu1  ;;  %v3378_v49 = vadd.f32 %v2656_v42, %v3348_v52 }
 0xd91   :  { %v3375_v47 = vadd.f32 %v3348_v52, %v1913_v44  ;;  %1968 = vmax.xlane.f32.xlu0 %v1967_v46 }
 0xd92   :  { %v1976_v29 = vsel %vm1942_vm4, %v3378_v49, -inf }
 0xd93   :  { %1971 = vmax.xlane.f32.xlu1 %v1970_v50  ;;  %v2659_v51 = vpop.f32.mrb[30].mxu1  ;;  %v1973_v23 = vsel %vm1942_vm4, %v3375_v47, -inf }
 0xd94   :  { %v1923_v53 = vpop.f32.mrb[31].mxu1  ;;  %v3387_v55 = vadd.f32 %v2659_v51, %v3348_v52 }
 0xd95   :  { %v3384_v54 = vadd.f32 %v3348_v52, %v1923_v53  ;;  %1974 = vmax.xlane.f32.xlu0 %v1973_v23 }
 0xd96   :  { %v1982_v45 = vsel %vm1942_vm4, %v3387_v55, -inf }
 0xd97   :  { %1977 = vmax.xlane.f32.xlu1 %v1976_v29  ;;  %v1979_v56 = vsel %vm1942_vm4, %v3384_v54, -inf }
 0xd99   :  { %1980 = vmax.xlane.f32.xlu0 %v1979_v56 }
 0xd9b   :  { %1983 = vmax.xlane.f32.xlu1 %v1982_v45 }
 0xe0e   :  { %v1948_v57 = vpop.xlane.xlu0 %1947 }
 0xe0f   :  { %v3395_v4 = vsub.f32 %v1869_v2, %v1948_v57 }
 0xe10   :  { %v1954_v12 = vpop.xlane.xlu1 %1953 }
 0xe11   :  { %v2009_v13 = vmul.f32 1.442695, %v3395_v4  ;;  %v3400_v59 = vsub.f32 %v1879_v8, %v1954_v12 }
 0xe12   :  { %v1945_v16 = vpop.xlane.xlu0 %1944 }
 0xe13   :  { %v3397_v26 = vsub.f32 %v1864_v6, %v1945_v16  ;;  %2798 = vpow2.f32 %v2009_v13  ;;  %v2013_v61 = vmul.f32 1.442695, %v3400_v59 }
 0xe14   :  { %v1951_v58 = vpop.xlane.xlu1 %1950 }
 0xe15   :  { %v2007_v39 = vmul.f32 1.442695, %v3397_v26  ;;  %v3403_v60 = vsub.f32 %v1874_v14, %v1951_v58 }
 0xe16   :  { %v1957_v7 = vpop.xlane.xlu0 %1956 }
 0xe17   :  { %2800 = vpow2.f32 %v2007_v39  ;;  %v2011_v43 = vmul.f32 1.442695, %v3403_v60  ;;  %v3409_v48 = vsub.f32 %v1884_v20, %v1957_v7 }
 0xe18   :  { %v1960_v21 = vpop.xlane.xlu1 %1959  ;;  %2802 = vpow2.f32 %v2013_v61 }
 0xe19   :  { %v3406_v62 = vsub.f32 %v1889_v22, %v1960_v21  ;;  %2804 = vpow2.f32 %v2011_v43  ;;  %v2015_v2 = vmul.f32 1.442695, %v3409_v48 }
 0xe1a   :  { %v1963_v35 = vpop.xlane.xlu0 %1962 }
 0xe1b   :  { %v2017_v10 = vmul.f32 1.442695, %v3406_v62  ;;  %v3415_v3 = vsub.f32 %v1894_v30, %v1963_v35 }
 0xe1c   :  { %v1966_v31 = vpop.xlane.xlu1 %1965 }
 0xe1d   :  { %v3412_v1 = vsub.f32 %v1899_v32, %v1966_v31  ;;  %2806 = vpow2.f32 %v2017_v10  ;;  %v2019_v18 = vmul.f32 1.442695, %v3415_v3  ;;  %v2799_v22 = vpop.eup %2798 }
 0xe1e   :  { %v1969_v0 = vpop.xlane.xlu0 %1968  ;;  %2808 = vpow2.f32 %v2015_v2  ;;  %v2042_v33 = vsel %vm1942_vm4, %v2799_v22, 0.0 }
 0xe1f   :  { %v2021_v11 = vmul.f32 1.442695, %v3412_v1  ;;  %v3428_v19 = vsub.f32 %v3368_v38, %v1969_v0 }
 0xe20   :  { %v1972_v63 = vpop.xlane.xlu1 %1971 }
 0xe21   :  { %v3421_v14 = vsub.f32 %v1909_v40, %v1972_v63  ;;  %v2801_v25 = vpop.eup %2800  ;;  %2810 = vpow2.f32 %v2021_v11  ;;  %v2023_v28 = vmul.f32 1.442695, %v3428_v19 }
 0xe22   :  { %v1975_v15 = vpop.xlane.xlu0 %1974  ;;  %2812 = vpow2.f32 %v2019_v18  ;;  %v2803_v34 = vpop.eup %2802  ;;  %v2039_v37 = vsel %vm1942_vm4, %v2801_v25, 0.0 }
 0xe23   :  { %v3440_v30 = vsub.f32 %v3375_v47, %v1975_v15  ;;  %v2805_v38 = vpop.eup %2804  ;;  %v2048_v46 = vsel %vm1942_vm4, %v2803_v34, 0.0 }
 0xe24   :  { %v1978_v6 = vpop.xlane.xlu1 %1977 }
 0xe25   :  { %v3436_v27 = vsub.f32 %v3378_v49, %v1978_v6  ;;  %v2027_v42 = vmul.f32 1.442695, %v3440_v30  ;;  %v2045_v49 = vsel %vm1942_vm4, %v2805_v38, 0.0 }
 0xe26   :  { %v1981_v36 = vpop.xlane.xlu0 %1980 }
 0xe27   :  { %v2029_v40 = vmul.f32 1.442695, %v3436_v27  ;;  %v3450_v44 = vsub.f32 %v3384_v54, %v1981_v36  ;;  %v2807_v47 = vpop.eup %2806 }
 0xe28   :  { %v1984_v32 = vpop.xlane.xlu1 %1983  ;;  %v2809_v50 = vpop.eup %2808  ;;  %v2054_v23 = vsel %vm1942_vm4, %v2807_v47, 0.0 }
 0xe29   :  { %v3446_v41 = vsub.f32 %v3387_v55, %v1984_v32  ;;  %v2031_v53 = vmul.f32 1.442695, %v3450_v44  ;;  %v2051_v54 = vsel %vm1942_vm4, %v2809_v50, 0.0 }
 0xe2b   :  { %v2033_v51 = vmul.f32 1.442695, %v3446_v41  ;;  %v2811_v55 = vpop.eup %2810 }
 0xe2c   :  { %v2813_v29 = vpop.eup %2812  ;;  %v2060_v56 = vsel %vm1942_vm4, %v2811_v55, 0.0 }
 0xe2d   :  { %v2057_v12 = vsel %vm1942_vm4, %v2813_v29, 0.0 }
 0xe51   :  { %v2662_v5 = vpop.f32.mrb[32].mxu1 }
 0xe52   :  { %v3418_v8 = vadd.f32 %v2662_v5, %v3348_v52  ;;  %v1933_v9 = vpop.f32.mrb[33].mxu1 }
 0xe53   :  { %v3424_v17 = vadd.f32 %v3348_v52, %v1933_v9  ;;  %v2025_v52 = vmul.f32 1.442695, %v3421_v14 }
 0xe54   :  { %v1988_v20 = vsel %vm1942_vm4, %v3418_v8, -inf }
 0xe55   :  { %1989 = vmax.xlane.f32.xlu1 %v1988_v20  ;;  %v1985_v24 = vsel %vm1942_vm4, %v3424_v17, -inf  ;;  %2814 = vpow2.f32 %v2025_v52 }
 0xe56   :  { %1986 = vmax.xlane.f32.xlu0 %v1985_v24  ;;  %2816 = vpow2.f32 %v2023_v28 }
 0xe57   :  { %2818 = vpow2.f32 %v2029_v40 }
 0xe58   :  { %2820 = vpow2.f32 %v2027_v42 }
 0xe59   :  { %2043 = vadd.xlane.f32.xlu1 %v2042_v33  ;;  %2822 = vpow2.f32 %v2033_v51 }
 0xe5a   :  { %2040 = vadd.xlane.f32.xlu0 %v2039_v37  ;;  %2824 = vpow2.f32 %v2031_v53 }
 0xe5d   :  { %2049 = vadd.xlane.f32.xlu1 %v2048_v46 }
 0xe5e   :  { %2046 = vadd.xlane.f32.xlu0 %v2045_v49 }
 0xe5f   :  { %v2815_v45 = vpop.eup %2814 }
 0xe60   :  { %v2817_v57 = vpop.eup %2816  ;;  %v2066_v58 = vsel %vm1942_vm4, %v2815_v45, 0.0 }
 0xe61   :  { %2055 = vadd.xlane.f32.xlu1 %v2054_v23  ;;  %v2819_v16 = vpop.eup %2818  ;;  %v2063_v21 = vsel %vm1942_vm4, %v2817_v57, 0.0 }
 0xe62   :  { %2052 = vadd.xlane.f32.xlu0 %v2051_v54  ;;  %v2821_v7 = vpop.eup %2820  ;;  %v2072_v31 = vsel %vm1942_vm4, %v2819_v16, 0.0 }
 0xe63   :  { %v2823_v13 = vpop.eup %2822  ;;  %v2069_v35 = vsel %vm1942_vm4, %v2821_v7, 0.0 }
 0xe64   :  { %v2825_v39 = vpop.eup %2824  ;;  %v2078_v61 = vsel %vm1942_vm4, %v2823_v13, 0.0 }
 0xe65   :  { %2061 = vadd.xlane.f32.xlu1 %v2060_v56  ;;  %v2075_v43 = vsel %vm1942_vm4, %v2825_v39, 0.0 }
 0xe66   :  { %2058 = vadd.xlane.f32.xlu0 %v2057_v12 }
 0xe69   :  { %2067 = vadd.xlane.f32.xlu1 %v2066_v58 }
 0xe6a   :  { %2064 = vadd.xlane.f32.xlu0 %v2063_v21 }
 0xe6d   :  { %2073 = vadd.xlane.f32.xlu1 %v2072_v31 }
 0xe6e   :  { %2070 = vadd.xlane.f32.xlu0 %v2069_v35 }
 0xe71   :  { %2079 = vadd.xlane.f32.xlu1 %v2078_v61 }
 0xe72   :  { %2076 = vadd.xlane.f32.xlu0 %v2075_v43 }
 0xee2   :  { %v1990_v63 = vpop.xlane.xlu1 %1989 }
 0xee3   :  { %v3467_v0 = vsub.f32 %v3418_v8, %v1990_v63  ;;  %v1987_v10 = vpop.xlane.xlu0 %1986 }
 0xee4   :  { %v3470_v2 = vsub.f32 %v3424_v17, %v1987_v10 }
 0xee5   :  { %v2037_v5 = vmul.f32 1.442695, %v3467_v0 }
 0xee6   :  { %v2035_v6 = vmul.f32 1.442695, %v3470_v2  ;;  %v2044_v9 = vpop.xlane.xlu1 %2043 }
 0xee7   :  { %2826 = vpow2.f32 %v2037_v5  ;;  %v2041_v11 = vpop.xlane.xlu0 %2040 }
 0xee8   :  { %2828 = vpow2.f32 %v2035_v6 }
 0xee9   :  { %2830 = vlog2.f32 %v2044_v9 }
 0xeea   :  { %2832 = vlog2.f32 %v2041_v11  ;;  %v2050_v15 = vpop.xlane.xlu1 %2049 }
 0xeeb   :  { %2834 = vlog2.f32 %v2050_v15  ;;  %v2047_v18 = vpop.xlane.xlu0 %2046 }
 0xeec   :  { %2836 = vlog2.f32 %v2047_v18 }
 0xeee   :  { %v2056_v8 = vpop.xlane.xlu1 %2055 }
 0xeef   :  { %2838 = vlog2.f32 %v2056_v8  ;;  %v2053_v20 = vpop.xlane.xlu0 %2052 }
 0xef0   :  { %2840 = vlog2.f32 %v2053_v20 }
 0xef1   :  { %v2827_v17 = vpop.eup %2826 }
 0xef2   :  { %v2829_v22 = vpop.eup %2828  ;;  %v2062_v24 = vpop.xlane.xlu1 %2061  ;;  %v2084_v25 = vsel %vm1942_vm4, %v2827_v17, 0.0 }
 0xef3   :  { %v2831_v52 = vpop.eup %2830  ;;  %2842 = vlog2.f32 %v2062_v24  ;;  %2085 = vadd.xlane.f32.xlu1 %v2084_v25  ;;  %v2059_v28 = vpop.xlane.xlu0 %2058  ;;  %v2081_v32 = vsel %vm1942_vm4, %v2829_v22, 0.0 }
 0xef4   :  { %v2833_v33 = vpop.eup %2832  ;;  %v2090_v34 = vmul.f32 0.6931472, %v2831_v52  ;;  %2844 = vlog2.f32 %v2059_v28  ;;  %2082 = vadd.xlane.f32.xlu0 %v2081_v32 }
 0xef5   :  { %v2835_v36 = vpop.eup %2834  ;;  %v2088_v37 = vmul.f32 0.6931472, %v2833_v33 }
 0xef6   :  { %v2837_v38 = vpop.eup %2836  ;;  %v2120_v40 = vsub.f32 %v3395_v4, %v2090_v34  ;;  %v2094_v42 = vmul.f32 0.6931472, %v2835_v36  ;;  %v2068_v46 = vpop.xlane.xlu1 %2067 }
 0xef7   :  { %v2119_v47 = vsub.f32 %v3397_v26, %v2088_v37  ;;  %v2092_v49 = vmul.f32 0.6931472, %v2837_v38  ;;  %2846 = vlog2.f32 %v2068_v46  ;;  %v2065_v50 = vpop.xlane.xlu0 %2064 }
 0xef8   :  { %2136 = vst.msk [vmem:[#allocation4 + $0x8] sm:$0xff] %vm1942_vm4, %v2120_v40  ;;  %v2122_v51 = vsub.f32 %v3400_v59, %v2094_v42  ;;  %2848 = vlog2.f32 %v2065_v50 }
 0xef9   :  { %v2839_v53 = vpop.eup %2838  ;;  %2135 = vst.msk [vmem:[#allocation4] sm:$0xff] %vm1942_vm4, %v2119_v47  ;;  %v2121_v23 = vsub.f32 %v3403_v60, %v2092_v49 }
 0xefa   :  { %v2841_v55 = vpop.eup %2840  ;;  %2138 = vst.msk [vmem:[#allocation4 + $0x18] sm:$0xff] %vm1942_vm4, %v2122_v51  ;;  %v2098_v4 = vmul.f32 0.6931472, %v2839_v53  ;;  %v2074_v54 = vpop.xlane.xlu1 %2073 }
 0xefb   :  { %2137 = vst.msk [vmem:[#allocation4 + $0x10] sm:$0xff] %vm1942_vm4, %v2121_v23  ;;  %v2096_v26 = vmul.f32 0.6931472, %v2841_v55  ;;  %2850 = vlog2.f32 %v2074_v54  ;;  %v2071_v29 = vpop.xlane.xlu0 %2070 }
 0xefc   :  { %v2124_v56 = vsub.f32 %v3406_v62, %v2098_v4  ;;  %2852 = vlog2.f32 %v2071_v29 }
 0xefd   :  { %v2843_v59 = vpop.eup %2842  ;;  %v2123_v45 = vsub.f32 %v3409_v48, %v2096_v26 }
 0xefe   :  { %v2845_v12 = vpop.eup %2844  ;;  %2140 = vst.msk [vmem:[#allocation4 + $0x28] sm:$0xff] %vm1942_vm4, %v2124_v56  ;;  %v2102_v60 = vmul.f32 0.6931472, %v2843_v59  ;;  %v2080_v57 = vpop.xlane.xlu1 %2079 }
 0xeff   :  { %2139 = vst.msk [vmem:[#allocation4 + $0x20] sm:$0xff] %vm1942_vm4, %v2123_v45  ;;  %v2100_v58 = vmul.f32 0.6931472, %v2845_v12  ;;  %2854 = vlog2.f32 %v2080_v57  ;;  %v2077_v16 = vpop.xlane.xlu0 %2076 }
 0xf00   :  { %v2126_v21 = vsub.f32 %v3412_v1, %v2102_v60  ;;  %2856 = vlog2.f32 %v2077_v16 }
 0xf01   :  { %v2847_v7 = vpop.eup %2846  ;;  %v2125_v62 = vsub.f32 %v3415_v3, %v2100_v58 }
 0xf02   :  { %v2849_v31 = vpop.eup %2848  ;;  %2142 = vst.msk [vmem:[#allocation4 + $0x38] sm:$0xff] %vm1942_vm4, %v2126_v21  ;;  %v2106_v48 = vmul.f32 0.6931472, %v2847_v7 }
 0xf03   :  { %2141 = vst.msk [vmem:[#allocation4 + $0x30] sm:$0xff] %vm1942_vm4, %v2125_v62  ;;  %v2104_v13 = vmul.f32 0.6931472, %v2849_v31 }
 0xf04   :  { %v2128_v35 = vsub.f32 %v3421_v14, %v2106_v48 }
 0xf05   :  { %v2851_v39 = vpop.eup %2850  ;;  %v2127_v61 = vsub.f32 %v3428_v19, %v2104_v13 }
 0xf06   :  { %v2853_v43 = vpop.eup %2852  ;;  %2144 = vst.msk [vmem:[#allocation4 + $0x48] sm:$0xff] %vm1942_vm4, %v2128_v35  ;;  %v2110_v1 = vmul.f32 0.6931472, %v2851_v39 }
 0xf07   :  { %2143 = vst.msk [vmem:[#allocation4 + $0x40] sm:$0xff] %vm1942_vm4, %v2127_v61  ;;  %v2108_v63 = vmul.f32 0.6931472, %v2853_v43 }
 0xf08   :  { %v2130_v3 = vsub.f32 %v3436_v27, %v2110_v1 }
 0xf09   :  { %v2855_v10 = vpop.eup %2854  ;;  %v2129_v5 = vsub.f32 %v3440_v30, %v2108_v63 }
 0xf0a   :  { %v2857_v6 = vpop.eup %2856  ;;  %2146 = vst.msk [vmem:[#allocation4 + $0x58] sm:$0xff] %vm1942_vm4, %v2130_v3  ;;  %v2114_v9 = vmul.f32 0.6931472, %v2855_v10 }
 0xf0b   :  { %2145 = vst.msk [vmem:[#allocation4 + $0x50] sm:$0xff] %vm1942_vm4, %v2129_v5  ;;  %v2112_v14 = vmul.f32 0.6931472, %v2857_v6 }
 0xf0c   :  { %v2132_v19 = vsub.f32 %v3446_v41, %v2114_v9 }
 0xf0d   :  { %v2131_v11 = vsub.f32 %v3450_v44, %v2112_v14 }
 0xf0e   :  { %2148 = vst.msk [vmem:[#allocation4 + $0x68] sm:$0xff] %vm1942_vm4, %v2132_v19 }
 0xf0f   :  { %2147 = vst.msk [vmem:[#allocation4 + $0x60] sm:$0xff] %vm1942_vm4, %v2131_v11 }
 0xf10   :  { %2873 = shalt.err (!%p2870_p4)
}
 0xf11   :  { %s2874_s0 = scalar_lea.hbm %s3541_s9, 128 }
 0xf12   :  { %p2875_p5 = scmp.ne.s32.totalorder %s3541_s9, %s2874_s0  ;;  %p2878_p6 = scmp.lt.u32.totalorder %s2874_s0, %s3541_s9 }
 0xf14   :  { %p2880_p7 = pnand %p2878_p6, %p2875_p5 }
 0xf16   :  { %2883 = shalt.err (!%p2880_p7)
}
 0xf17   :  { %2173 = dma.vmem_to_hbm [thread:$0]  %s2171_s3, 128, %s3541_s9, [#allocation7]  }
 0xf18   :  { %s2914_s13 = smov [#allocation4]  }
 0xf19   :  { %s2157_s4 = sshll.u32 %s2914_s13, 4  ;;  %s2158_s4 = int_to_ptr.vmem [resolvable:$true] %s2157_s4 }
 0xf1a   :  { %s2884_s9 = scalar_lea.vmem %s2158_s4, 2048  ;;  %p2889_p9 = scmp.lt.s32.totalorder %s2158_s4, %s2158_s4 }
 0xf1b   :  { %p2885_p8 = scmp.ne.s32.totalorder %s2158_s4, %s2884_s9  ;;  %p2890_p10 = scmp.lt.s32.totalorder %s2884_s9, %s2884_s9 }
 0xf1d   :  { %p2891_p11 = por %p2890_p10, %p2889_p9 }
 0xf1f   :  { %p2892_p12 = pnand %p2891_p11, %p2885_p8 }
 0xf80   :  { %v2086_v27 = vpop.xlane.xlu1 %2085 }
 0xf81   :  { %2858 = vlog2.f32 %v2086_v27  ;;  %v2083_v30 = vpop.xlane.xlu0 %2082 }
 0xf82   :  { %2860 = vlog2.f32 %v2083_v30 }
 0xf8b   :  { %v2859_v41 = vpop.eup %2858 }
 0xf8c   :  { %v2861_v44 = vpop.eup %2860  ;;  %v2118_v15 = vmul.f32 0.6931472, %v2859_v41 }
 0xf8d   :  { %v2116_v18 = vmul.f32 0.6931472, %v2861_v44 }
 0xf8e   :  { %v2134_v8 = vsub.f32 %v3467_v0, %v2118_v15 }
 0xf8f   :  { %v2133_v20 = vsub.f32 %v3470_v2, %v2116_v18 }
 0xf90   :  { %2150 = vst.msk [vmem:[#allocation4 + $0x78] sm:$0xff] %vm1942_vm4, %v2134_v8 }
 0xf91   :  { %2149 = vst.msk [vmem:[#allocation4 + $0x70] sm:$0xff] %vm1942_vm4, %v2133_v20 }
 0xf92   :  { %2895 = shalt.err (!%p2892_p12)
}
 0xf93   :  { %s2896_s16 = scalar_lea.hbm %s3540_s8, 2048 }
 0xf94   :  { %p2897_p13 = scmp.ne.s32.totalorder %s3540_s8, %s2896_s16  ;;  %p2900_p0 = scmp.lt.u32.totalorder %s2896_s16, %s3540_s8 }
 0xf96   :  { %p2902_p1 = pnand %p2900_p0, %p2897_p13 }
 0xf98   :  { %2905 = shalt.err (!%p2902_p1)
}
 0xf99   :  { %s2915_s20 = smov 128   ;;  %s2916_s21 = smov 8  }
 0xf9a   :  { %2163 = dma.vmem_to_hbm [thread:$0]  %s2158_s4, 2048, %s3540_s8, [#allocation5], %s2915_s20, %s2915_s20, %s2916_s21  }
 0xf9b   :  { %2906 = dma.done.wait [#allocation5], 2048  }
 0xf9c   :  { %2907 = vsyncadd [#allocation5], 4294965248 }
 0xf9d   :  { %2908 = dma.done.wait [#allocation7], 128  }
 0xf9e   :  { %2909 = vsyncadd [#allocation7], 4294967168 }
 0xf9f   :  { %2180 = vsyncpa [#allocation5], 1 }
 0xfa0   :  { %2181 = vsyncpa [#allocation7], 1 }

</bundles_post_ra>
